<compile_context>
chip_gen: v7x
topology: tpu7x:2x2x1
jax: 0.10.0
libtpu: 0.0.40
codegen_flags: <defaults>
</compile_context>

<pallas_src>
import math
import functools

import jax
import jax.numpy as jnp
from jax import lax
from jax.experimental import pallas as pl
from jax.experimental.pallas import tpu as pltpu


# ----------------------------- kernel helpers -----------------------------

def _linear(x, w, b):
    # weights stored (in_features, out_features) in bf16; accumulate in f32.
    y = jnp.dot(x.astype(w.dtype), w, preferred_element_type=jnp.float32)
    return y + b


def _layer_norm(x, gamma, beta, eps):
    mean = jnp.mean(x, axis=-1, keepdims=True)
    var = jnp.mean((x - mean) ** 2, axis=-1, keepdims=True)
    return (x - mean) * lax.rsqrt(var + eps) * gamma + beta


# ------------------------------ Pallas kernel ------------------------------

def encoder_layer_kernel(x_ref, wqkv_ref, bqkv_ref, wo_ref, bo_ref,
                         ln1w_ref, ln1b_ref, w1_ref, b1_ref, w2_ref, b2_ref,
                         ln2w_ref, ln2b_ref, out_ref,
                         *, seq, batch, nhead, head_dim, eps):
    d_model = nhead * head_dim

    # Step 0: load the (already position-encoded) activations into the output
    # block; it stays resident in VMEM across all L grid steps.
    @pl.when(pl.program_id(0) == 0)
    def _():
        out_ref[...] = x_ref[...]

    x = out_ref[...]                                       # (B*S, D) f32

    # ---- multi-head self-attention (post-norm layer, part 1) ----
    qkv = _linear(x, wqkv_ref[...], bqkv_ref[...])         # (B*S, 3D) f32
    scale = 1.0 / math.sqrt(head_dim)
    q = qkv[:, :d_model] * scale                           # fold scale in once
    k = qkv[:, d_model:2 * d_model]
    v = qkv[:, 2 * d_model:]

    def to_heads(t):                                       # (B*S, D) -> (B*H, S, hd)
        t = t.reshape(batch, seq, nhead, head_dim)
        return t.transpose((0, 2, 1, 3)).reshape(batch * nhead, seq, head_dim)

    qh, kh, vh = to_heads(q), to_heads(k), to_heads(v)
    s = jnp.einsum('bqd,bkd->bqk', qh, kh,
                   preferred_element_type=jnp.float32)     # (B*H, S, S)
    s = s - jnp.max(s, axis=-1, keepdims=True)
    p = jnp.exp(s)
    p = p / jnp.sum(p, axis=-1, keepdims=True)
    o = jnp.einsum('bqk,bkd->bqd', p, vh,
                   preferred_element_type=jnp.float32)     # (B*H, S, hd)
    attn = o.reshape(batch, nhead, seq, head_dim)
    attn = attn.transpose((0, 2, 1, 3)).reshape(batch * seq, d_model)

    attn = _linear(attn, wo_ref[...], bo_ref[...])         # out_proj
    h1 = _layer_norm(x + attn, ln1w_ref[...], ln1b_ref[...], eps)   # norm1(x + sa)

    # ---- feed-forward (post-norm layer, part 2) ----
    ff = _linear(h1, w1_ref[...], b1_ref[...])
    ff = jnp.maximum(ff, 0.0)                              # relu (f32 on VPU)
    ff = _linear(ff, w2_ref[...], b2_ref[...])
    out_ref[...] = _layer_norm(h1 + ff, ln2w_ref[...], ln2b_ref[...], eps)


# ----------------------------- parameter setup -----------------------------

def make_positional_encoding(d_model, max_len=200):
    position = jnp.arange(max_len, dtype=jnp.float32)[:, None]
    div_term = jnp.exp(jnp.arange(0, d_model, 2, dtype=jnp.float32)
                       * (-math.log(10000.0) / d_model))
    pe = jnp.zeros((max_len, d_model), dtype=jnp.float32)
    pe = pe.at[:, 0::2].set(jnp.sin(position * div_term))
    pe = pe.at[:, 1::2].set(jnp.cos(position * div_term))
    return pe


_WEIGHT_NAMES = ('wqkv', 'bqkv', 'wo', 'bo', 'ln1w', 'ln1b',
                 'w1', 'b1', 'w2', 'b2', 'ln2w', 'ln2b')


def init_params(key, d_model, n_layers, dim_ff=2048):
    layers = []
    for _ in range(n_layers):
        key, k1, k2, k3, k4 = jax.random.split(key, 5)
        layers.append(dict(
            # matmul weights: (in_features, out_features), bf16 (f32 accumulate)
            wqkv=(0.02 * jax.random.normal(k1, (d_model, 3 * d_model),
                                           jnp.float32)).astype(jnp.bfloat16),
            bqkv=jnp.zeros((1, 3 * d_model), jnp.float32),
            wo=(0.02 * jax.random.normal(k2, (d_model, d_model),
                                         jnp.float32)).astype(jnp.bfloat16),
            bo=jnp.zeros((1, d_model), jnp.float32),
            ln1w=jnp.ones((1, d_model), jnp.float32),
            ln1b=jnp.zeros((1, d_model), jnp.float32),
            w1=(0.02 * jax.random.normal(k3, (d_model, dim_ff),
                                         jnp.float32)).astype(jnp.bfloat16),
            b1=jnp.zeros((1, dim_ff), jnp.float32),
            w2=(0.02 * jax.random.normal(k4, (dim_ff, d_model),
                                         jnp.float32)).astype(jnp.bfloat16),
            b2=jnp.zeros((1, d_model), jnp.float32),
            ln2w=jnp.ones((1, d_model), jnp.float32),
            ln2b=jnp.zeros((1, d_model), jnp.float32),
        ))
    # stack per-layer weights along a leading L axis for the fused grid=(L,) call
    stacked = {k: jnp.stack([lp[k] for lp in layers]) for k in layers[0]}
    return dict(pe=make_positional_encoding(d_model), layers=stacked)


# ------------------------------ forward wrapper ------------------------------

def transformer_encoder_forward(feats, params, *, nhead=4, eps=1e-5):
    """feats: (S, B, D) float32, matching the PyTorch module's layout."""
    S, B, D = feats.shape
    assert D % nhead == 0
    head_dim = D // nhead

    # Positional encoding add in plain JAX (dropout p=0.0 -> identity).
    x = feats + params['pe'][:S][:, None, :]               # (S, B, D)
    # glue: reorder to batch-major flat slab for the kernel
    x = jnp.transpose(x, (1, 0, 2)).reshape(B * S, D)

    weights = [params['layers'][n] for n in _WEIGHT_NAMES]  # each has leading L
    n_layers = weights[0].shape[0]

    def layer_spec(arr):
        nd = arr.ndim
        # squeeze the L axis; index only along it
        return pl.BlockSpec((None,) + arr.shape[1:],
                            lambda l, _nd=nd: (l,) + (0,) * (_nd - 1))

    kernel = functools.partial(encoder_layer_kernel, seq=S, batch=B,
                               nhead=nhead, head_dim=head_dim, eps=eps)

    y = pl.pallas_call(
        kernel,
        out_shape=jax.ShapeDtypeStruct((B * S, D), jnp.float32),
        grid=(n_layers,),
        in_specs=[pl.BlockSpec((B * S, D), lambda l: (0, 0))]
                 + [layer_spec(a) for a in weights],
        # same block every grid step -> activations stay resident in VMEM
        out_specs=pl.BlockSpec((B * S, D), lambda l: (0, 0)),
        compiler_params=pltpu.CompilerParams(
            dimension_semantics=("arbitrary",)),
    )(x, *weights)

    return y.reshape(B, S, D).transpose(1, 0, 2)            # back to (S, B, D)


# ----------------------------------- main -----------------------------------

if __name__ == "__main__":
    SEQ, BATCH, D_MODEL, N_LAYERS = 8, 2, 32, 2   # input_dim == output_dim == 32

    key = jax.random.PRNGKey(0)
    key, kx, kp = jax.random.split(key, 3)
    feats = jax.random.normal(kx, (SEQ, BATCH, D_MODEL), jnp.float32)
    params = init_params(kp, D_MODEL, N_LAYERS)

    out = transformer_encoder_forward(feats, params)
    out = jax.block_until_ready(out)
    assert out.shape == (SEQ, BATCH, D_MODEL)
    assert bool(jnp.all(jnp.isfinite(out)))
    print("KERNEL_OK")
</pallas_src>

<mosaic_0001>
module attributes {stable_mosaic.version = 11 : i64} {
  func.func @encoder_layer_kernel(%arg0: i32, %arg1: memref<16x32xf32, #tpu.memory_space<vmem>>, %arg2: memref<1x32x96xbf16, #tpu.memory_space<vmem>>, %arg3: memref<1x1x96xf32, #tpu.memory_space<vmem>>, %arg4: memref<1x32x32xbf16, #tpu.memory_space<vmem>>, %arg5: memref<1x1x32xf32, #tpu.memory_space<vmem>>, %arg6: memref<1x1x32xf32, #tpu.memory_space<vmem>>, %arg7: memref<1x1x32xf32, #tpu.memory_space<vmem>>, %arg8: memref<1x32x2048xbf16, #tpu.memory_space<vmem>>, %arg9: memref<1x1x2048xf32, #tpu.memory_space<vmem>>, %arg10: memref<1x2048x32xbf16, #tpu.memory_space<vmem>>, %arg11: memref<1x1x32xf32, #tpu.memory_space<vmem>>, %arg12: memref<1x1x32xf32, #tpu.memory_space<vmem>>, %arg13: memref<1x1x32xf32, #tpu.memory_space<vmem>>, %arg14: memref<16x32xf32, #tpu.memory_space<vmem>>) attributes {dimension_semantics = [#tpu.dimension_semantics<arbitrary>], iteration_bounds = array<i64: 2>, scalar_prefetch = 0 : i64, scratch_operands = 0 : i64, tpu.core_type = #tpu.core_type<tc>, window_params = [{pipeline_mode = #tpu.pipeline_mode<synchronous>, transform_indices = @transform_0, window_bounds = array<i64: 16, 32>}, {transform_indices = @transform_1, window_bounds = array<i64: 1, 32, 96>}, {transform_indices = @transform_2, window_bounds = array<i64: 1, 1, 96>}, {transform_indices = @transform_3, window_bounds = array<i64: 1, 32, 32>}, {transform_indices = @transform_4, window_bounds = array<i64: 1, 1, 32>}, {transform_indices = @transform_5, window_bounds = array<i64: 1, 1, 32>}, {transform_indices = @transform_6, window_bounds = array<i64: 1, 1, 32>}, {transform_indices = @transform_7, window_bounds = array<i64: 1, 32, 2048>}, {transform_indices = @transform_8, window_bounds = array<i64: 1, 1, 2048>}, {transform_indices = @transform_9, window_bounds = array<i64: 1, 2048, 32>}, {transform_indices = @transform_10, window_bounds = array<i64: 1, 1, 32>}, {transform_indices = @transform_11, window_bounds = array<i64: 1, 1, 32>}, {transform_indices = @transform_12, window_bounds = array<i64: 1, 1, 32>}, {pipeline_mode = #tpu.pipeline_mode<synchronous>, transform_indices = @transform_13, window_bounds = array<i64: 16, 32>}]} {
    %c0_i32 = arith.constant 0 : i32
    %0 = arith.cmpi eq, %arg0, %c0_i32 : i32
    %1 = arith.extui %0 : i1 to i32
    %c0_i32_0 = arith.constant 0 : i32
    %2 = arith.cmpi ne, %1, %c0_i32_0 : i32
    scf.if %2 {
      %c0_59 = arith.constant 0 : index
      %c0_60 = arith.constant 0 : index
      %121 = vector.load %arg1[%c0_59, %c0_60] : memref<16x32xf32, #tpu.memory_space<vmem>>, vector<16x32xf32>
      %c0_61 = arith.constant 0 : index
      %c0_62 = arith.constant 0 : index
      %122 = vector.load %arg14[%c0_61, %c0_62] : memref<16x32xf32, #tpu.memory_space<vmem>>, vector<16x32xf32>
      tpu.vector_store %arg14[%c0_61, %c0_62], %121 {strides = array<i32>} : memref<16x32xf32, #tpu.memory_space<vmem>>, vector<16x32xf32>,
    } else {
    }
    %c0 = arith.constant 0 : index
    %c0_1 = arith.constant 0 : index
    %3 = vector.load %arg14[%c0, %c0_1] : memref<16x32xf32, #tpu.memory_space<vmem>>, vector<16x32xf32>
    %c0_2 = arith.constant 0 : index
    %c0_3 = arith.constant 0 : index
    %c0_4 = arith.constant 0 : index
    %4 = vector.load %arg2[%c0_2, %c0_3, %c0_4] : memref<1x32x96xbf16, #tpu.memory_space<vmem>>, vector<1x32x96xbf16>
    %5 = vector.shape_cast %4 : vector<1x32x96xbf16> to vector<32x96xbf16>
    %c0_5 = arith.constant 0 : index
    %c0_6 = arith.constant 0 : index
    %c0_7 = arith.constant 0 : index
    %6 = vector.load %arg3[%c0_5, %c0_6, %c0_7] : memref<1x1x96xf32, #tpu.memory_space<vmem>>, vector<1x1x96xf32>
    %7 = vector.shape_cast %6 : vector<1x1x96xf32> to vector<1x96xf32>
    %8 = arith.truncf %3 : vector<16x32xf32> to vector<16x32xbf16>
    %cst = arith.constant dense<0.000000e+00> : vector<16x96xf32>
    %9 = tpu.matmul %8, %5, %cst {dimension_numbers = #tpu.dot_dimension_numbers<[1], [0], [0], [1], [0, 0, 1, 1], [], []>} : vector<16x32xbf16>, vector<32x96xbf16>, vector<16x96xf32> -> vector<16x96xf32>
    %10 = vector.broadcast %7 : vector<1x96xf32> to vector<16x96xf32>
    %11 = arith.addf %9, %10 : vector<16x96xf32>
    %12 = vector.extract_strided_slice %11 {offsets = [0, 0], sizes = [16, 32], strides = [1, 1]} : vector<16x96xf32> to vector<16x32xf32>
    %cst_8 = arith.constant 0.353553385 : f32
    %13 = vector.broadcast %cst_8 : f32 to vector<16x32xf32>
    %14 = arith.mulf %12, %13 : vector<16x32xf32>
    %15 = vector.extract_strided_slice %11 {offsets = [0, 32], sizes = [16, 32], strides = [1, 1]} : vector<16x96xf32> to vector<16x32xf32>
    %16 = vector.extract_strided_slice %11 {offsets = [0, 64], sizes = [16, 32], strides = [1, 1]} : vector<16x96xf32> to vector<16x32xf32>
    %17 = vector.shape_cast %14 : vector<16x32xf32> to vector<2x8x4x8xf32>
    %18 = tpu.transpose %17, [0, 2, 1, 3] : vector<2x8x4x8xf32> -> vector<2x4x8x8xf32>
    %19 = vector.shape_cast %18 : vector<2x4x8x8xf32> to vector<8x8x8xf32>
    %20 = vector.shape_cast %15 : vector<16x32xf32> to vector<2x8x4x8xf32>
    %21 = tpu.transpose %20, [0, 2, 1, 3] : vector<2x8x4x8xf32> -> vector<2x4x8x8xf32>
    %22 = vector.shape_cast %21 : vector<2x4x8x8xf32> to vector<8x8x8xf32>
    %23 = vector.shape_cast %16 : vector<16x32xf32> to vector<2x8x4x8xf32>
    %24 = tpu.transpose %23, [0, 2, 1, 3] : vector<2x8x4x8xf32> -> vector<2x4x8x8xf32>
    %25 = vector.shape_cast %24 : vector<2x4x8x8xf32> to vector<8x8x8xf32>
    "tpu.trace_start"() <{level = 10 : i32, message = "bqd,bkd->bqk"}> : () -> ()
    %cst_9 = arith.constant dense<0.000000e+00> : vector<8x8x8xf32>
    %26 = tpu.matmul %19, %22, %cst_9 {dimension_numbers = #tpu.dot_dimension_numbers<[2], [2], [1], [1], [0, 0, 0, 1, 1, 1], [0], [0]>} : vector<8x8x8xf32>, vector<8x8x8xf32>, vector<8x8x8xf32> -> vector<8x8x8xf32>
    "tpu.trace_stop"() : () -> ()
    %cst_10 = arith.constant dense<0xFF800000> : vector<8x8xf32>
    %27 = vector.multi_reduction <maximumf>, %26, %cst_10 [2] : vector<8x8x8xf32> to vector<8x8xf32>
    %28 = vector.shape_cast %27 : vector<8x8xf32> to vector<8x8x1xf32>
    %29 = vector.broadcast %28 : vector<8x8x1xf32> to vector<8x8x8xf32>
    %30 = arith.subf %26, %29 : vector<8x8x8xf32>
    %31 = math.exp %30 : vector<8x8x8xf32>
    %cst_11 = arith.constant dense<0.000000e+00> : vector<8x8xf32>
    %32 = vector.multi_reduction <add>, %31, %cst_11 [2] : vector<8x8x8xf32> to vector<8x8xf32>
    %33 = vector.shape_cast %32 : vector<8x8xf32> to vector<8x8x1xf32>
    %34 = vector.broadcast %33 : vector<8x8x1xf32> to vector<8x8x8xf32>
    %35 = arith.divf %31, %34 : vector<8x8x8xf32>
    "tpu.trace_start"() <{level = 10 : i32, message = "bqk,bkd->bqd"}> : () -> ()
    %cst_12 = arith.constant dense<0.000000e+00> : vector<8x8x8xf32>
    %36 = tpu.matmul %35, %25, %cst_12 {dimension_numbers = #tpu.dot_dimension_numbers<[2], [1], [1], [2], [0, 0, 0, 1, 1, 2], [0], [0]>} : vector<8x8x8xf32>, vector<8x8x8xf32>, vector<8x8x8xf32> -> vector<8x8x8xf32>
    "tpu.trace_stop"() : () -> ()
    %37 = vector.shape_cast %36 : vector<8x8x8xf32> to vector<2x4x8x8xf32>
    %38 = tpu.transpose %37, [0, 2, 1, 3] : vector<2x4x8x8xf32> -> vector<2x8x4x8xf32>
    %39 = vector.shape_cast %38 : vector<2x8x4x8xf32> to vector<16x32xf32>
    %c0_13 = arith.constant 0 : index
    %c0_14 = arith.constant 0 : index
    %c0_15 = arith.constant 0 : index
    %40 = vector.load %arg4[%c0_13, %c0_14, %c0_15] : memref<1x32x32xbf16, #tpu.memory_space<vmem>>, vector<1x32x32xbf16>
    %41 = vector.shape_cast %40 : vector<1x32x32xbf16> to vector<32x32xbf16>
    %c0_16 = arith.constant 0 : index
    %c0_17 = arith.constant 0 : index
    %c0_18 = arith.constant 0 : index
    %42 = vector.load %arg5[%c0_16, %c0_17, %c0_18] : memref<1x1x32xf32, #tpu.memory_space<vmem>>, vector<1x1x32xf32>
    %43 = vector.shape_cast %42 : vector<1x1x32xf32> to vector<1x32xf32>
    %44 = arith.truncf %39 : vector<16x32xf32> to vector<16x32xbf16>
    %cst_19 = arith.constant dense<0.000000e+00> : vector<16x32xf32>
    %45 = tpu.matmul %44, %41, %cst_19 {dimension_numbers = #tpu.dot_dimension_numbers<[1], [0], [0], [1], [0, 0, 1, 1], [], []>} : vector<16x32xbf16>, vector<32x32xbf16>, vector<16x32xf32> -> vector<16x32xf32>
    %46 = vector.broadcast %43 : vector<1x32xf32> to vector<16x32xf32>
    %47 = arith.addf %45, %46 : vector<16x32xf32>
    %48 = arith.addf %3, %47 : vector<16x32xf32>
    %c0_20 = arith.constant 0 : index
    %c0_21 = arith.constant 0 : index
    %c0_22 = arith.constant 0 : index
    %49 = vector.load %arg6[%c0_20, %c0_21, %c0_22] : memref<1x1x32xf32, #tpu.memory_space<vmem>>, vector<1x1x32xf32>
    %50 = vector.shape_cast %49 : vector<1x1x32xf32> to vector<1x32xf32>
    %c0_23 = arith.constant 0 : index
    %c0_24 = arith.constant 0 : index
    %c0_25 = arith.constant 0 : index
    %51 = vector.load %arg7[%c0_23, %c0_24, %c0_25] : memref<1x1x32xf32, #tpu.memory_space<vmem>>, vector<1x1x32xf32>
    %52 = vector.shape_cast %51 : vector<1x1x32xf32> to vector<1x32xf32>
    %cst_26 = arith.constant dense<0.000000e+00> : vector<16xf32>
    %53 = vector.multi_reduction <add>, %48, %cst_26 [1] : vector<16x32xf32> to vector<16xf32>
    %54 = vector.shape_cast %53 : vector<16xf32> to vector<16x1xf32>
    %cst_27 = arith.constant 3.200000e+01 : f32
    %55 = vector.broadcast %cst_27 : f32 to vector<16x1xf32>
    %56 = arith.divf %54, %55 : vector<16x1xf32>
    %57 = vector.broadcast %56 : vector<16x1xf32> to vector<16x32xf32>
    %58 = arith.subf %48, %57 : vector<16x32xf32>
    %59 = arith.mulf %58, %58 : vector<16x32xf32>
    %cst_28 = arith.constant dense<0.000000e+00> : vector<16xf32>
    %60 = vector.multi_reduction <add>, %59, %cst_28 [1] : vector<16x32xf32> to vector<16xf32>
    %61 = vector.shape_cast %60 : vector<16xf32> to vector<16x1xf32>
    %cst_29 = arith.constant 3.200000e+01 : f32
    %62 = vector.broadcast %cst_29 : f32 to vector<16x1xf32>
    %63 = arith.divf %61, %62 : vector<16x1xf32>
    %64 = vector.broadcast %56 : vector<16x1xf32> to vector<16x32xf32>
    %65 = arith.subf %48, %64 : vector<16x32xf32>
    %cst_30 = arith.constant 9.99999974E-6 : f32
    %66 = vector.broadcast %cst_30 : f32 to vector<16x1xf32>
    %67 = arith.addf %63, %66 : vector<16x1xf32>
    %68 = math.rsqrt %67 : vector<16x1xf32>
    %69 = vector.broadcast %68 : vector<16x1xf32> to vector<16x32xf32>
    %70 = arith.mulf %65, %69 : vector<16x32xf32>
    %71 = vector.broadcast %50 : vector<1x32xf32> to vector<16x32xf32>
    %72 = arith.mulf %70, %71 : vector<16x32xf32>
    %73 = vector.broadcast %52 : vector<1x32xf32> to vector<16x32xf32>
    %74 = arith.addf %72, %73 : vector<16x32xf32>
    %c0_31 = arith.constant 0 : index
    %c0_32 = arith.constant 0 : index
    %c0_33 = arith.constant 0 : index
    %75 = vector.load %arg8[%c0_31, %c0_32, %c0_33] : memref<1x32x2048xbf16, #tpu.memory_space<vmem>>, vector<1x32x2048xbf16>
    %76 = vector.shape_cast %75 : vector<1x32x2048xbf16> to vector<32x2048xbf16>
    %c0_34 = arith.constant 0 : index
    %c0_35 = arith.constant 0 : index
    %c0_36 = arith.constant 0 : index
    %77 = vector.load %arg9[%c0_34, %c0_35, %c0_36] : memref<1x1x2048xf32, #tpu.memory_space<vmem>>, vector<1x1x2048xf32>
    %78 = vector.shape_cast %77 : vector<1x1x2048xf32> to vector<1x2048xf32>
    %79 = arith.truncf %74 : vector<16x32xf32> to vector<16x32xbf16>
    %cst_37 = arith.constant dense<0.000000e+00> : vector<16x2048xf32>
    %80 = tpu.matmul %79, %76, %cst_37 {dimension_numbers = #tpu.dot_dimension_numbers<[1], [0], [0], [1], [0, 0, 1, 1], [], []>} : vector<16x32xbf16>, vector<32x2048xbf16>, vector<16x2048xf32> -> vector<16x2048xf32>
    %81 = vector.broadcast %78 : vector<1x2048xf32> to vector<16x2048xf32>
    %82 = arith.addf %80, %81 : vector<16x2048xf32>
    %cst_38 = arith.constant 0.000000e+00 : f32
    %83 = vector.broadcast %cst_38 : f32 to vector<16x2048xf32>
    %84 = arith.maximumf %82, %83 : vector<16x2048xf32>
    %c0_39 = arith.constant 0 : index
    %c0_40 = arith.constant 0 : index
    %c0_41 = arith.constant 0 : index
    %85 = vector.load %arg10[%c0_39, %c0_40, %c0_41] : memref<1x2048x32xbf16, #tpu.memory_space<vmem>>, vector<1x2048x32xbf16>
    %86 = vector.shape_cast %85 : vector<1x2048x32xbf16> to vector<2048x32xbf16>
    %c0_42 = arith.constant 0 : index
    %c0_43 = arith.constant 0 : index
    %c0_44 = arith.constant 0 : index
    %87 = vector.load %arg11[%c0_42, %c0_43, %c0_44] : memref<1x1x32xf32, #tpu.memory_space<vmem>>, vector<1x1x32xf32>
    %88 = vector.shape_cast %87 : vector<1x1x32xf32> to vector<1x32xf32>
    %89 = arith.truncf %84 : vector<16x2048xf32> to vector<16x2048xbf16>
    %cst_45 = arith.constant dense<0.000000e+00> : vector<16x32xf32>
    %90 = tpu.matmul %89, %86, %cst_45 {dimension_numbers = #tpu.dot_dimension_numbers<[1], [0], [0], [1], [0, 0, 1, 1], [], []>} : vector<16x2048xbf16>, vector<2048x32xbf16>, vector<16x32xf32> -> vector<16x32xf32>
    %91 = vector.broadcast %88 : vector<1x32xf32> to vector<16x32xf32>
    %92 = arith.addf %90, %91 : vector<16x32xf32>
    %93 = arith.addf %74, %92 : vector<16x32xf32>
    %c0_46 = arith.constant 0 : index
    %c0_47 = arith.constant 0 : index
    %c0_48 = arith.constant 0 : index
    %94 = vector.load %arg12[%c0_46, %c0_47, %c0_48] : memref<1x1x32xf32, #tpu.memory_space<vmem>>, vector<1x1x32xf32>
    %95 = vector.shape_cast %94 : vector<1x1x32xf32> to vector<1x32xf32>
    %c0_49 = arith.constant 0 : index
    %c0_50 = arith.constant 0 : index
    %c0_51 = arith.constant 0 : index
    %96 = vector.load %arg13[%c0_49, %c0_50, %c0_51] : memref<1x1x32xf32, #tpu.memory_space<vmem>>, vector<1x1x32xf32>
    %97 = vector.shape_cast %96 : vector<1x1x32xf32> to vector<1x32xf32>
    %cst_52 = arith.constant dense<0.000000e+00> : vector<16xf32>
    %98 = vector.multi_reduction <add>, %93, %cst_52 [1] : vector<16x32xf32> to vector<16xf32>
    %99 = vector.shape_cast %98 : vector<16xf32> to vector<16x1xf32>
    %cst_53 = arith.constant 3.200000e+01 : f32
    %100 = vector.broadcast %cst_53 : f32 to vector<16x1xf32>
    %101 = arith.divf %99, %100 : vector<16x1xf32>
    %102 = vector.broadcast %101 : vector<16x1xf32> to vector<16x32xf32>
    %103 = arith.subf %93, %102 : vector<16x32xf32>
    %104 = arith.mulf %103, %103 : vector<16x32xf32>
    %cst_54 = arith.constant dense<0.000000e+00> : vector<16xf32>
    %105 = vector.multi_reduction <add>, %104, %cst_54 [1] : vector<16x32xf32> to vector<16xf32>
    %106 = vector.shape_cast %105 : vector<16xf32> to vector<16x1xf32>
    %cst_55 = arith.constant 3.200000e+01 : f32
    %107 = vector.broadcast %cst_55 : f32 to vector<16x1xf32>
    %108 = arith.divf %106, %107 : vector<16x1xf32>
    %109 = vector.broadcast %101 : vector<16x1xf32> to vector<16x32xf32>
    %110 = arith.subf %93, %109 : vector<16x32xf32>
    %cst_56 = arith.constant 9.99999974E-6 : f32
    %111 = vector.broadcast %cst_56 : f32 to vector<16x1xf32>
    %112 = arith.addf %108, %111 : vector<16x1xf32>
    %113 = math.rsqrt %112 : vector<16x1xf32>
    %114 = vector.broadcast %113 : vector<16x1xf32> to vector<16x32xf32>
    %115 = arith.mulf %110, %114 : vector<16x32xf32>
    %116 = vector.broadcast %95 : vector<1x32xf32> to vector<16x32xf32>
    %117 = arith.mulf %115, %116 : vector<16x32xf32>
    %118 = vector.broadcast %97 : vector<1x32xf32> to vector<16x32xf32>
    %119 = arith.addf %117, %118 : vector<16x32xf32>
    %c0_57 = arith.constant 0 : index
    %c0_58 = arith.constant 0 : index
    %120 = vector.load %arg14[%c0_57, %c0_58] : memref<16x32xf32, #tpu.memory_space<vmem>>, vector<16x32xf32>
    tpu.vector_store %arg14[%c0_57, %c0_58], %119 {strides = array<i32>} : memref<16x32xf32, #tpu.memory_space<vmem>>, vector<16x32xf32>,
    return
  }
  func.func @transform_0(%arg0: i32) -> (i32, i32) {
    %c0_i32 = arith.constant 0 : i32
    %c0_i32_0 = arith.constant 0 : i32
    %c0_i32_1 = arith.constant 0 : i32
    return %c0_i32, %c0_i32_0 : i32, i32
  }
  func.func @transform_1(%arg0: i32) -> (i32, i32, i32) {
    %c0_i32 = arith.constant 0 : i32
    %c0_i32_0 = arith.constant 0 : i32
    %c0_i32_1 = arith.constant 0 : i32
    return %arg0, %c0_i32, %c0_i32_0 : i32, i32, i32
  }
  func.func @transform_2(%arg0: i32) -> (i32, i32, i32) {
    %c0_i32 = arith.constant 0 : i32
    %c0_i32_0 = arith.constant 0 : i32
    %c0_i32_1 = arith.constant 0 : i32
    return %arg0, %c0_i32, %c0_i32_0 : i32, i32, i32
  }
  func.func @transform_3(%arg0: i32) -> (i32, i32, i32) {
    %c0_i32 = arith.constant 0 : i32
    %c0_i32_0 = arith.constant 0 : i32
    %c0_i32_1 = arith.constant 0 : i32
    return %arg0, %c0_i32, %c0_i32_0 : i32, i32, i32
  }
  func.func @transform_4(%arg0: i32) -> (i32, i32, i32) {
    %c0_i32 = arith.constant 0 : i32
    %c0_i32_0 = arith.constant 0 : i32
    %c0_i32_1 = arith.constant 0 : i32
    return %arg0, %c0_i32, %c0_i32_0 : i32, i32, i32
  }
  func.func @transform_5(%arg0: i32) -> (i32, i32, i32) {
    %c0_i32 = arith.constant 0 : i32
    %c0_i32_0 = arith.constant 0 : i32
    %c0_i32_1 = arith.constant 0 : i32
    return %arg0, %c0_i32, %c0_i32_0 : i32, i32, i32
  }
  func.func @transform_6(%arg0: i32) -> (i32, i32, i32) {
    %c0_i32 = arith.constant 0 : i32
    %c0_i32_0 = arith.constant 0 : i32
    %c0_i32_1 = arith.constant 0 : i32
    return %arg0, %c0_i32, %c0_i32_0 : i32, i32, i32
  }
  func.func @transform_7(%arg0: i32) -> (i32, i32, i32) {
    %c0_i32 = arith.constant 0 : i32
    %c0_i32_0 = arith.constant 0 : i32
    %c0_i32_1 = arith.constant 0 : i32
    return %arg0, %c0_i32, %c0_i32_0 : i32, i32, i32
  }
  func.func @transform_8(%arg0: i32) -> (i32, i32, i32) {
    %c0_i32 = arith.constant 0 : i32
    %c0_i32_0 = arith.constant 0 : i32
    %c0_i32_1 = arith.constant 0 : i32
    return %arg0, %c0_i32, %c0_i32_0 : i32, i32, i32
  }
  func.func @transform_9(%arg0: i32) -> (i32, i32, i32) {
    %c0_i32 = arith.constant 0 : i32
    %c0_i32_0 = arith.constant 0 : i32
    %c0_i32_1 = arith.constant 0 : i32
    return %arg0, %c0_i32, %c0_i32_0 : i32, i32, i32
  }
  func.func @transform_10(%arg0: i32) -> (i32, i32, i32) {
    %c0_i32 = arith.constant 0 : i32
    %c0_i32_0 = arith.constant 0 : i32
    %c0_i32_1 = arith.constant 0 : i32
    return %arg0, %c0_i32, %c0_i32_0 : i32, i32, i32
  }
  func.func @transform_11(%arg0: i32) -> (i32, i32, i32) {
    %c0_i32 = arith.constant 0 : i32
    %c0_i32_0 = arith.constant 0 : i32
    %c0_i32_1 = arith.constant 0 : i32
    return %arg0, %c0_i32, %c0_i32_0 : i32, i32, i32
  }
  func.func @transform_12(%arg0: i32) -> (i32, i32, i32) {
    %c0_i32 = arith.constant 0 : i32
    %c0_i32_0 = arith.constant 0 : i32
    %c0_i32_1 = arith.constant 0 : i32
    return %arg0, %c0_i32, %c0_i32_0 : i32, i32, i32
  }
  func.func @transform_13(%arg0: i32) -> (i32, i32) {
    %c0_i32 = arith.constant 0 : i32
    %c0_i32_0 = arith.constant 0 : i32
    %c0_i32_1 = arith.constant 0 : i32
    return %c0_i32, %c0_i32_0 : i32, i32
  }
}

</mosaic_0001>

<bundles_post_ra>
// kernel: tpu_custom_call.1
= control target key start
LH: loop header
LB: loop body
LE: loop exit
PB: predicated region body
PF: predicated region fallthrough
CT: control target
= control target key end

     0   :  { %s7202_s0 = inlined_call_operand.vmem [shape: f32[16,32], index: 0, kind: input, shape index: {}]   ;;  %s7203_s1 = inlined_call_operand.vmem [shape: bf16[2,32,96], index: 1, kind: input, shape index: {}]   ;;  %s7204_s2 = inlined_call_operand.vmem [shape: f32[2,1,96], index: 2, kind: input, shape index: {}]   ;;  %s7205_s3 = inlined_call_operand.vmem [shape: bf16[2,32,32], index: 3, kind: input, shape index: {}]   ;;  %s7206_s4 = inlined_call_operand.vmem [shape: f32[2,1,32], index: 4, kind: input, shape index: {}]   ;;  %s7207_s5 = inlined_call_operand.vmem [shape: f32[2,1,32], index: 5, kind: input, shape index: {}]   ;;  %s7208_s6 = inlined_call_operand.vmem [shape: f32[2,1,32], index: 6, kind: input, shape index: {}]   ;;  %s7209_s7 = inlined_call_operand.vmem [shape: bf16[2,32,2048], index: 7, kind: input, shape index: {}]   ;;  %s7210_s8 = inlined_call_operand.vmem [shape: f32[2,1,2048], index: 8, kind: input, shape index: {}]   ;;  %s7211_s9 = inlined_call_operand.vmem [shape: bf16[2,2048,32], index: 9, kind: input, shape index: {}]   ;;  %s7212_s10 = inlined_call_operand.vmem [shape: f32[2,1,32], index: 10, kind: input, shape index: {}]   ;;  %s7213_s11 = inlined_call_operand.vmem [shape: f32[2,1,32], index: 11, kind: input, shape index: {}]   ;;  %s7214_s12 = inlined_call_operand.vmem [shape: f32[2,1,32], index: 12, kind: input, shape index: {}]   ;;  %s7215_s13 = inlined_call_operand.hbm [shape: f32[16,32], index: 13, kind: output, shape index: {}]  }
   0x1   :  { %7219 = sst [smem:[#allocation6_spill]] %s7202_s0 }
   0x2   :  { %7220 = sst [smem:[#allocation7_spill]] %s7203_s1 }
   0x3   :  { %7221 = sst [smem:[#allocation8_spill]] %s7205_s3 }
   0x4   :  { %7222 = sst [smem:[#allocation9_spill]] %s7215_s13 }
   0x5   :  { %18 = vsyncpa [#allocation3], 0  ;;  %s6415_s25 = smov 0  }
   0x6 LB: > { %7223 = sst [smem:[#allocation5_spill]] %s6328_s25  ;;  %s6421_s26 = sadd.s32 4294967295, %s6328_s25   ;;  %s6328_s25 = sphi %s6415_s25, %s24_s25  }
   0x7   : > { %p5524_p0 = scmp.ge.s32.totalorder %s6328_s25, 1  ;;  %p478_p1 = scmp.lt.s32.totalorder %s6328_s25, 3 }
   0x9   : > { %p479_p2 = pnand %p5524_p0, %p478_p1 }
   0xa   : > { %p557_p3 = scmp.lt.s32.totalorder (!%p479_p2), %s6421_s26, 1  ;;  %s7224_s1 = sld [smem:[#allocation7_spill]] (!%p479_p2) }
   0xb   : > { %482 = sbr.rel (%p479_p2) target bundleno = 2888 (0xb48), region = 72  ;;  %s7225_s3 = sld [smem:[#allocation8_spill]] (!%p479_p2) }
   0xc   : > { %p5534_p4 = scmp.ne.s32.totalorder (!%p479_p2), %s6421_s26, 0 }
  0x12   : > { %s6427_s27 = scalar_select %p557_p3, %s6421_s26, 1 }
  0x13   : > { %606 = sbr.rel (%p5534_p4) target bundleno = 27 (0x1b), region = 76  ;;  %s7226_s23 = sld [smem:[#allocation6_spill]] (!%p5534_p4)  ;;  %vm609_vm0 = vcmask (!%p5534_p4), 261120  }
  0x14   : > { %s5760_s28 = sshll.u32 %s6427_s27, 4  ;;  %s5762_s14 = sshll.u32 %s6427_s27, 8 }
  0x15   : > { %s561_s17 = scalar_lea.vmem %s7224_s1, %s5760_s28  ;;  %s6440_s20 = scalar_lea.vmem %s7225_s3, %s5760_s28 }
  0x16   : > { %s6458_s1 = scalar_lea.vmem %s7209_s7, %s5762_s14  ;;  %s6463_s3 = scalar_lea.vmem %s7210_s8, %s5760_s28 }
  0x17   : > { %s5763_s21 = sshll.u32 %s6427_s27, 10  ;;  %s595_s25 = scalar_lea.vmem %s7212_s10, %s6427_s27 }
  0x18   : > { %s6473_s0 = scalar_lea.vmem %s7211_s9, %s5763_s21  ;;  %s598_s14 = scalar_lea.vmem %s7213_s11, %s6427_s27 }
  0x19   : > { %s601_s18 = scalar_lea.vmem %s7214_s12, %s6427_s27  ;;  %v607_v0 = vld [vmem:[%s7226_s23] sm:$0xff] (!%p5534_p4)  ;;  %v608_v1 = vld [vmem:[%s7226_s23 + $0x8] sm:$0xff] (!%p5534_p4) }
  0x1a   : > { %610 = vst.msk [vmem:[#allocation2] sm:$0xff] %vm609_vm0, %v607_v0  ;;  %611 = vst.msk [vmem:[#allocation2 + $0x8] sm:$0xff] %vm609_vm0, %v608_v1 }
  0x1b PF: > { %v6118_v2 = vld [vmem:[%s561_s17] sm:$0xff]   ;;  %v6330_v3 = vmov 0.0   ;;  %v6119_v4 = vld [vmem:[%s561_s17 + $0x8] sm:$0xff]   ;;  %vm6331_vm1 = vmmov 0   ;;  %vm638_vm2 = vcmask 261120   ;;  %s7227_s21 = scalar_lea.vmem %s7204_s2, %s6427_s27  ;;  %s6332_s24 = smov 104   ;;  %v710_v26 = vlaneseq }
  0x1c   : > { %5978 = vmatprep.subr.bf16.mxu0 %v6330_v3  ;;  %5986 = vmatprep.subr.mxu1 %v6330_v3  ;;  %v5535_v8 = vld [vmem:[%s7227_s21] ss:$0 sm:$0xff]  ;;  %s6333_s29 = smov 120   ;;  %s6334_s15 = smov 112   ;;  %v6337_v24 = vmov 1983009808  }
  0x1d   : > { %5979 = vmatpush3.bf16.msra.mxu0 %v6118_v2  ;;  %5982 = vmatprep.mubr.msk.bf16.mxu0 %vm6331_vm1, %v6330_v3  ;;  %s6335_s16 = smov 96   ;;  %s6336_s28 = smov 64   ;;  %v708_v25 = vunpack.c.l.s4 %v6337_v24  ;;  %v6338_v28 = vmov 1934713408   ;;  %v6546_v31 = vshrl.u32 %v710_v26, 7  ;;  %vm1583_vm3 = vcmask 64512  }
  0x1e   : > { %5980 = vmatprep.subr.bf16.mxu0 %v6330_v3  ;;  %5988 = vmatprep.mubr.msk.f32.mxu1 %vm6331_vm1, %v6330_v3  ;;  %v740_v29 = vunpack.c.l.s4 %v6338_v28  ;;  %s6339_s19 = smov 16   ;;  %s6340_s22 = smov 8   ;;  %vm3162_vm4 = vcmask 130048   ;;  %vm3165_vm5 = vcmask 195584  }
  0x1f   : > { %v709_v30 = vunpack.c.0.s8 %v708_v25  ;;  %s6341_s13 = smov 24   ;;  %s7228_s30 = scalar_lea.vmem %s7206_s4, %s6427_s27 }
  0x20   : > { %v741_v34 = vunpack.c.0.s8 %v740_v29  ;;  %p6078_p5 = scmp.eq.s32.totalorder %s6421_s26, 1 }
  0x21   : > { %v612_v5 = vld [vmem:[#allocation2] sm:$0xff]  ;;  %v613_v6 = vld [vmem:[#allocation2 + $0x8] sm:$0xff]  ;;  %5981 = vmatpush3.bf16.msra.mxu0 %v6119_v4  ;;  %v6549_v35 = vsub.s32 %v709_v30, %v6546_v31 }
  0x22   : > { %v619_v7 = vpack.c.bf16 %v613_v6, %v612_v5  ;;  %6001 = vmatprep.subr.mxu0 %v6330_v3  ;;  %v6552_v42 = vsub.s32 %v741_v34, %v6546_v31 }
  0x24   : > { %5983 = vmatmul.mubr.msk.bf16.vlgmr.msra.gmra.mrb[0].mxu0 %vm638_vm2, %v619_v7 }
  0x25   : > { %6003 = vmatprep.mubr.msk.f32.mxu0 %vm6331_vm1, %v6330_v3 }
  0xf7   : > { %v676_v9 = vpop.f32.mrb[0].mxu0 }
  0xf8   : > { %v677_v10 = vadd.f32 %v5535_v8, %v676_v9  ;;  %v5984_v11 = vpop.f32.mrb[1].mxu0 }
  0xf9   : > { %v679_v12 = vpop.f32.mrb[2].mxu0 }
  0xfa   : > { %987 = vrot.lane.b32.xlu1 %v677_v10, %s6332_s24  ;;  %979 = vrot.lane.b32.xlu0 %v677_v10, %s6333_s29  ;;  %v5985_v13 = vpop.f32.mrb[3].mxu0  ;;  %v6507_v14 = vadd.f32 %v5535_v8, %v679_v12  ;;  %v6513_v15 = vmul.f32 0.35355338, %v677_v10 }
  0xfc   : > { %v6532_v20 = vmul.f32 0.35355338, %v6507_v14 }
  0xfe   : > { %983 = vrot.lane.b32.xlu0 %v677_v10, %s6334_s15  ;;  %981 = vrot.lane.b32.xlu1 %v6507_v14, %s6333_s29 }
 0x102   : > { %985 = vrot.lane.b32.xlu0 %v6507_v14, %s6334_s15  ;;  %989 = vrot.lane.b32.xlu1 %v6507_v14, %s6332_s24 }
 0x106   : > { %991 = vrot.lane.b32.xlu0 %v677_v10, %s6335_s16  ;;  %693 = vrot.lane.b32.xlu1 %v6513_v15, %s6334_s15 }
 0x10a   : > { %687 = vrot.lane.b32.xlu0 %v6513_v15, %s6333_s29 }
 0x16c   : > { %v6517_v16 = vpop.permute.xlu0 %979  ;;  %v6520_v17 = vpop.permute.xlu1 %987 }
 0x16d   : > { %995 = vrot.lane.b32.xlu1 %v6517_v16, %s6335_s16 }
 0x170   : > { %v6522_v18 = vpop.permute.xlu0 %983  ;;  %v6529_v19 = vpop.permute.xlu1 %981 }
 0x171   : > { %999 = vrot.lane.b32.xlu0 %v6522_v18, %s6335_s16  ;;  %1003 = vrot.lane.b32.xlu1 %v6520_v17, %s6335_s16 }
 0x174   : > { %v6536_v21 = vpop.permute.xlu0 %985  ;;  %v6538_v22 = vpop.permute.xlu1 %989 }
 0x175   : > { %699 = vrot.lane.b32.xlu0 %v6513_v15, %s6332_s24  ;;  %993 = vrot.lane.b32.xlu1 %v6507_v14, %s6335_s16 }
 0x178   : > { %v992_v23 = vpop.permute.xlu0 %991  ;;  %v694_v27 = vpop.permute.xlu1 %693 }
 0x179   : > { %997 = vrot.lane.b32.xlu0 %v6529_v19, %s6335_s16  ;;  %689 = vrot.lane.b32.xlu1 %v6532_v20, %s6333_s29  ;;  %v705_v47 = vcombine.low %v6513_v15, %v694_v27  ;;  %v706_v48 = vcombine.high %v6513_v15, %v694_v27  ;;  %s7229_s29 = scalar_lea.vmem %s7207_s5, %s6427_s27 }
 0x17b   : > { %v713_v61 = vrot.slane %v705_v47, %v6549_v35  ;;  %v720_v62 = vrot.slane %v706_v48, %v6549_v35 }
 0x17c   : > { %v688_v32 = vpop.permute.xlu0 %687 }
 0x17d   : > { %1005 = vrot.lane.b32.xlu0 %v6538_v22, %s6335_s16  ;;  %1001 = vrot.lane.b32.xlu1 %v6536_v21, %s6335_s16 }
 0x181   : > { %695 = vrot.lane.b32.xlu0 %v6532_v20, %s6334_s15  ;;  %701 = vrot.lane.b32.xlu1 %v6532_v20, %s6332_s24 }
 0x185   : > { %1287 = vrot.lane.b32.xlu1 %v677_v10, %s6336_s28 }
 0x1df   : > { %v996_v33 = vpop.permute.xlu1 %995 }
 0x1e3   : > { %v1000_v36 = vpop.permute.xlu0 %999  ;;  %v1004_v37 = vpop.permute.xlu1 %1003 }
 0x1e4   : > { %v1015_v38 = vcombine.low %v992_v23, %v1000_v36  ;;  %v1016_v39 = vcombine.high %v992_v23, %v1000_v36  ;;  %v1031_v40 = vcombine.low %v996_v33, %v1004_v37  ;;  %v1032_v41 = vcombine.high %v996_v33, %v1004_v37 }
 0x1e6   : > { %v1023_v43 = vrot.slane %v1015_v38, %v6549_v35  ;;  %v1030_v44 = vrot.slane %v1016_v39, %v6549_v35  ;;  %v1039_v45 = vrot.slane %v1031_v40, %v6549_v35  ;;  %v1046_v46 = vrot.slane %v1032_v41, %v6549_v35 }
 0x1e7   : > { %v700_v49 = vpop.permute.xlu0 %699  ;;  %v994_v50 = vpop.permute.xlu1 %993 }
 0x1e8   : > { %v1047_v51 = vcombine.low %v1023_v43, %v1039_v45  ;;  %v1048_v52 = vcombine.high %v1023_v43, %v1039_v45  ;;  %v1063_v53 = vcombine.low %v1030_v44, %v1046_v46  ;;  %v1064_v54 = vcombine.high %v1030_v44, %v1046_v46 }
 0x1e9   : > { %v721_v55 = vcombine.low %v688_v32, %v700_v49  ;;  %v722_v56 = vcombine.high %v688_v32, %v700_v49 }
 0x1ea   : > { %v1055_v57 = vrot.slane %v1047_v51, %v6552_v42  ;;  %v1062_v58 = vrot.slane %v1048_v52, %v6552_v42  ;;  %v1071_v59 = vrot.slane %v1063_v53, %v6552_v42  ;;  %v1078_v60 = vrot.slane %v1064_v54, %v6552_v42 }
 0x1eb   : > { %v729_v63 = vrot.slane %v721_v55, %v6549_v35  ;;  %v736_v0 = vrot.slane %v722_v56, %v6549_v35  ;;  %v998_v1 = vpop.permute.xlu0 %997  ;;  %v690_v2 = vpop.permute.xlu1 %689 }
 0x1ec   : > { %v1151_v4 = vcombine.low %v1055_v57, %v1062_v58  ;;  %v5543_v5 = vcombine.high %v1055_v57, %v1062_v58  ;;  %v1167_v10 = vcombine.low %v1071_v59, %v1078_v60  ;;  %v5544_v11 = vcombine.high %v1071_v59, %v1078_v60 }
 0x1ed   : > { %v737_v6 = vcombine.low %v713_v61, %v729_v63  ;;  %v738_v7 = vcombine.high %v713_v61, %v729_v63  ;;  %v753_v8 = vcombine.low %v720_v62, %v736_v0  ;;  %v754_v9 = vcombine.high %v720_v62, %v736_v0 }
 0x1ee   : > { %v6569_v12 = vrot.slane %v1151_v4, %v6549_v35  ;;  %v6572_v13 = vrot.slane %v5543_v5, %v6549_v35  ;;  %v1174_v46 = vrot.slane %v1167_v10, %v6549_v35  ;;  %v1182_v47 = vrot.slane %v5544_v11, %v6549_v35 }
 0x1ef   : > { %v745_v15 = vrot.slane %v737_v6, %v6552_v42  ;;  %v752_v23 = vrot.slane %v738_v7, %v6552_v42  ;;  %v761_v24 = vrot.slane %v753_v8, %v6552_v42  ;;  %v768_v25 = vrot.slane %v754_v9, %v6552_v42  ;;  %v1006_v26 = vpop.permute.xlu0 %1005  ;;  %v1002_v27 = vpop.permute.xlu1 %1001 }
 0x1f0   : > { %v1099_v28 = vcombine.low %v998_v1, %v1006_v26  ;;  %v1100_v29 = vcombine.high %v998_v1, %v1006_v26  ;;  %v1083_v30 = vcombine.low %v994_v50, %v1002_v27  ;;  %v1084_v32 = vcombine.high %v994_v50, %v1002_v27 }
 0x1f1   : > { %v841_v33 = vcombine.low %v745_v15, %v752_v23  ;;  %v5539_v34 = vcombine.high %v745_v15, %v752_v23  ;;  %v857_v36 = vcombine.low %v761_v24, %v768_v25  ;;  %v5540_v37 = vcombine.high %v761_v24, %v768_v25 }
 0x1f2   : > { %v1107_v38 = vrot.slane %v1099_v28, %v6549_v35  ;;  %v1114_v39 = vrot.slane %v1100_v29, %v6549_v35  ;;  %v1091_v40 = vrot.slane %v1083_v30, %v6549_v35  ;;  %v1098_v41 = vrot.slane %v1084_v32, %v6549_v35 }
 0x1f3   : > { %v6583_v43 = vrot.slane %v841_v33, %v6549_v35  ;;  %v6586_v44 = vrot.slane %v5539_v34, %v6549_v35  ;;  %v696_v45 = vpop.permute.xlu0 %695  ;;  %v702_v52 = vpop.permute.xlu1 %701  ;;  %v6591_v53 = vrot.slane %v857_v36, %v6549_v35  ;;  %v6594_v54 = vrot.slane %v5540_v37, %v6549_v35 }
 0x1f4   : > { %v1115_v48 = vcombine.low %v1091_v40, %v1107_v38  ;;  %v1116_v49 = vcombine.high %v1091_v40, %v1107_v38  ;;  %v1131_v50 = vcombine.low %v1098_v41, %v1114_v39  ;;  %v1132_v51 = vcombine.high %v1098_v41, %v1114_v39 }
 0x1f5   : > { %v773_v55 = vcombine.low %v6532_v20, %v696_v45  ;;  %v774_v56 = vcombine.high %v6532_v20, %v696_v45  ;;  %v789_v63 = vcombine.low %v690_v2, %v702_v52  ;;  %v790_v0 = vcombine.high %v690_v2, %v702_v52 }
 0x1f6   : > { %v1123_v57 = vrot.slane %v1115_v48, %v6552_v42  ;;  %v1130_v58 = vrot.slane %v1116_v49, %v6552_v42  ;;  %v1139_v59 = vrot.slane %v1131_v50, %v6552_v42  ;;  %v1146_v60 = vrot.slane %v1132_v51, %v6552_v42 }
 0x1f7   : > { %v781_v61 = vrot.slane %v773_v55, %v6549_v35  ;;  %v788_v62 = vrot.slane %v774_v56, %v6549_v35  ;;  %v797_v20 = vrot.slane %v789_v63, %v6549_v35  ;;  %v804_v7 = vrot.slane %v790_v0, %v6549_v35 }
 0x1f8   : > { %v1219_v1 = vcombine.low %v1123_v57, %v1130_v58  ;;  %v5545_v4 = vcombine.high %v1123_v57, %v1130_v58  ;;  %v1235_v5 = vcombine.low %v1139_v59, %v1146_v60  ;;  %v5546_v6 = vcombine.high %v1139_v59, %v1146_v60 }
 0x1f9   : > { %v1183_v8 = vcombine.low %v6569_v12, %v6572_v13  ;;  %v1184_v9 = vcombine.high %v6569_v12, %v6572_v13  ;;  %v805_v23 = vcombine.low %v781_v61, %v797_v20  ;;  %v806_v24 = vcombine.high %v781_v61, %v797_v20 }
 0x1fa   : > { %v1226_v10 = vrot.slane %v1219_v1, %v6549_v35  ;;  %v1234_v11 = vrot.slane %v5545_v4, %v6549_v35  ;;  %v1242_v2 = vrot.slane %v1235_v5, %v6549_v35  ;;  %v1250_v15 = vrot.slane %v5546_v6, %v6549_v35 }
 0x1fb   : > { %v821_v25 = vcombine.low %v788_v62, %v804_v7  ;;  %v822_v26 = vcombine.high %v788_v62, %v804_v7  ;;  %v874_v27 = vcombine.high %v6583_v43, %v6586_v44  ;;  %v890_v28 = vcombine.high %v6591_v53, %v6594_v54 }
 0x1fc   : > { %v1251_v12 = vcombine.low %v1226_v10, %v1234_v11  ;;  %v1267_v13 = vcombine.low %v1242_v2, %v1250_v15  ;;  %v813_v29 = vrot.slane %v805_v23, %v6552_v42  ;;  %v820_v30 = vrot.slane %v806_v24, %v6552_v42 }
 0x1fd   : > { %v829_v32 = vrot.slane %v821_v25, %v6552_v42  ;;  %v836_v33 = vrot.slane %v822_v26, %v6552_v42  ;;  %v1191_v34 = vrot.slane %v1183_v8, %v6552_v42  ;;  %v1199_v36 = vcombine.low %v1174_v46, %v1182_v47 }
 0x1fe   : > { %v1200_v37 = vcombine.high %v1174_v46, %v1182_v47  ;;  %v1198_v38 = vrot.slane %v1184_v9, %v6552_v42  ;;  %v909_v39 = vcombine.low %v813_v29, %v820_v30  ;;  %v5541_v40 = vcombine.high %v813_v29, %v820_v30 }
 0x1ff   : > { %v925_v41 = vcombine.low %v829_v32, %v836_v33  ;;  %v5542_v45 = vcombine.high %v829_v32, %v836_v33  ;;  %v1207_v48 = vrot.slane %v1199_v36, %v6552_v42  ;;  %v873_v50 = vcombine.low %v6583_v43, %v6586_v44 }
 0x200   : > { %v1214_v49 = vrot.slane %v1200_v37, %v6552_v42  ;;  %v889_v51 = vcombine.low %v6591_v53, %v6594_v54  ;;  %v916_v52 = vrot.slane %v909_v39, %v6549_v35  ;;  %v924_v46 = vrot.slane %v5541_v40, %v6549_v35 }
 0x201   : > { %v932_v47 = vrot.slane %v925_v41, %v6549_v35  ;;  %v940_v55 = vrot.slane %v5542_v45, %v6549_v35  ;;  %v1215_v56 = vcombine.low %v1191_v34, %v1207_v48  ;;  %v881_v58 = vrot.slane %v873_v50, %v6552_v42 }
 0x202   : > { %v1218_v57 = vcombine.high %v1198_v38, %v1214_v49  ;;  %v1252_v59 = vcombine.high %v1226_v10, %v1234_v11  ;;  %v941_v60 = vcombine.low %v916_v52, %v924_v46  ;;  %v897_v43 = vrot.slane %v889_v51, %v6552_v42 }
 0x203   : > { %v957_v61 = vcombine.low %v932_v47, %v940_v55  ;;  %5987 = vmatpush3.xpose.msk.msra.mxu1 %vm1583_vm3, %v1215_v56  ;;  %v888_v44 = vrot.slane %v874_v27, %v6552_v42  ;;  %v904_v53 = vrot.slane %v890_v28, %v6552_v42  ;;  %v1268_v54 = vcombine.high %v1242_v2, %v1250_v15 }
 0x204   : > { %6002 = vmatpush3.xpose.msk.msra.mxu0 %vm1583_vm3, %v1218_v57  ;;  %5991 = vmatprep.subr.mxu1 %v6330_v3  ;;  %v1259_v62 = vrot.slane %v1251_v12, %v6552_v42  ;;  %v1275_v63 = vrot.slane %v1267_v13, %v6552_v42  ;;  %v905_v0 = vcombine.low %v881_v58, %v897_v43 }
 0x205   : > { %6011 = vmatprep.subr.mxu0 %v6330_v3  ;;  %v908_v1 = vcombine.high %v888_v44, %v904_v53  ;;  %v1216_v4 = vcombine.high %v1191_v34, %v1207_v48  ;;  %v949_v6 = vrot.slane %v941_v60, %v6552_v42  ;;  %v965_v20 = vrot.slane %v957_v61, %v6552_v42  ;;  %v1288_v61 = vpop.permute.xlu1 %1287 }
 0x206   : > { %v1284_v5 = vcombine.high %v1259_v62, %v1275_v63  ;;  %v942_v7 = vcombine.high %v916_v52, %v924_v46  ;;  %v958_v8 = vcombine.high %v932_v47, %v940_v55  ;;  %5989 = vmatmul.mubr.msk.f32.vlgmr.msra.gmra.mrb[0].mxu1 %vm1583_vm3, %v905_v0  ;;  %v1266_v9 = vrot.slane %v1252_v59, %v6552_v42 }
 0x207   : > { %6004 = vmatmul.mubr.msk.f32.vlgmr.msra.gmra.mrb[4].mxu0 %vm1583_vm3, %v908_v1  ;;  %5992 = vmatpush3.xpose.msk.msra.mxu1 %vm1583_vm3, %v1216_v4  ;;  %v1282_v10 = vrot.slane %v1268_v54, %v6552_v42  ;;  %v906_v11 = vcombine.high %v881_v58, %v897_v43  ;;  %v974_v2 = vcombine.high %v949_v6, %v965_v20 }
 0x208   : > { %5993 = vmatprep.mubr.msk.f32.mxu1 %vm6331_vm1, %v6330_v3  ;;  %5996 = vmatprep.subr.mxu1 %v6330_v3  ;;  %v1217_v15 = vcombine.low %v1198_v38, %v1214_v49  ;;  %v956_v23 = vrot.slane %v942_v7, %v6552_v42  ;;  %v972_v24 = vrot.slane %v958_v8, %v6552_v42 }
 0x209   : > { %6012 = vmatpush3.xpose.msk.msra.mxu0 %vm1583_vm3, %v1284_v5  ;;  %6013 = vmatprep.mubr.msk.f32.mxu0 %vm6331_vm1, %v6330_v3  ;;  %v1283_v25 = vcombine.low %v1259_v62, %v1275_v63  ;;  %v1286_v26 = vcombine.high %v1266_v9, %v1282_v10  ;;  %v907_v27 = vcombine.low %v888_v44, %v904_v53 }
 0x20a   : > { %6021 = vmatprep.subr.mxu0 %v6330_v3  ;;  %5994 = vmatmul.mubr.msk.f32.vlgmr.msra.gmra.mrb[2].mxu1 %vm1583_vm3, %v906_v11  ;;  %v973_v28 = vcombine.low %v949_v6, %v965_v20  ;;  %v976_v12 = vcombine.high %v956_v23, %v972_v24  ;;  %v1285_v13 = vcombine.low %v1266_v9, %v1282_v10 }
 0x20b   : > { %5997 = vmatpush3.xpose.msk.msra.mxu1 %vm1583_vm3, %v1217_v15  ;;  %5998 = vmatprep.mubr.msk.f32.mxu1 %vm6331_vm1, %v6330_v3  ;;  %v975_v29 = vcombine.low %v956_v23, %v972_v24 }
 0x20c   : > { %6006 = vmatprep.subr.mxu1 %v6330_v3  ;;  %6014 = vmatmul.mubr.msk.f32.vlgmr.msra.gmra.mrb[6].mxu0 %vm1583_vm3, %v974_v2 }
 0x20d   : > { %6022 = vmatpush3.xpose.msk.msra.mxu0 %vm1583_vm3, %v1286_v26  ;;  %6023 = vmatprep.mubr.msk.f32.mxu0 %vm6331_vm1, %v6330_v3 }
 0x20e   : > { %5999 = vmatmul.mubr.msk.f32.vlgmr.msra.gmra.mrb[4].mxu1 %vm1583_vm3, %v907_v27  ;;  %6031 = vmatprep.subr.mxu0 %v6330_v3 }
 0x20f   : > { %6007 = vmatpush3.xpose.msk.msra.mxu1 %vm1583_vm3, %v1283_v25  ;;  %6008 = vmatprep.mubr.msk.f32.mxu1 %vm6331_vm1, %v6330_v3 }
 0x210   : > { %6016 = vmatprep.subr.mxu1 %v6330_v3  ;;  %6024 = vmatmul.mubr.msk.f32.vlgmr.msra.gmra.mrb[8].mxu0 %vm1583_vm3, %v976_v12 }
 0x211   : > { %6033 = vmatprep.mubr.msk.f32.mxu0 %vm6331_vm1, %v6330_v3 }
 0x212   : > { %6009 = vmatmul.mubr.msk.f32.vlgmr.msra.gmra.mrb[6].mxu1 %vm1583_vm3, %v973_v28 }
 0x213   : > { %6017 = vmatpush3.xpose.msk.msra.mxu1 %vm1583_vm3, %v1285_v13  ;;  %6018 = vmatprep.mubr.msk.f32.mxu1 %vm6331_vm1, %v6330_v3 }
 0x214   : > { %6026 = vmatprep.subr.mxu1 %v6330_v3 }
 0x216   : > { %6019 = vmatmul.mubr.msk.f32.vlgmr.msra.gmra.mrb[8].mxu1 %vm1583_vm3, %v975_v29 }
 0x217   : > { %6028 = vmatprep.mubr.msk.f32.mxu1 %vm6331_vm1, %v6330_v3 }
 0x2d9   : > { %v1656_v30 = vpop.f32.mrb[0].mxu1 }
 0x2da   : > { %v1884_v32 = vpop.f32.mrb[4].mxu0  ;;  %v5990_v33 = vpop.f32.mrb[1].mxu1  ;;  %v2192_v36 = vsel %vm1583_vm3, %v1656_v30, -inf }
 0x2db   : > { %v6005_v34 = vpop.f32.mrb[5].mxu0  ;;  %2193 = vmax.xlane.f32.xlu0 %v2192_v36  ;;  %v2201_v40 = vsel %vm1583_vm3, %v1884_v32, -inf }
 0x2dd   : > { %v1732_v37 = vpop.f32.mrb[2].mxu1 }
 0x2de   : > { %v5995_v38 = vpop.f32.mrb[3].mxu1  ;;  %v2195_v39 = vsel %vm1583_vm3, %v1732_v37, -inf }
 0x2df   : > { %2196 = vmax.xlane.f32.xlu1 %v2195_v39  ;;  %2202 = vmax.xlane.f32.xlu0 %v2201_v40  ;;  %v2036_v41 = vpop.f32.mrb[6].mxu0 }
 0x2e0   : > { %v6015_v45 = vpop.f32.mrb[7].mxu0  ;;  %v2207_v48 = vsel %vm1583_vm3, %v2036_v41, -inf }
 0x2e1   : > { %v1808_v49 = vpop.f32.mrb[4].mxu1 }
 0x2e2   : > { %v6000_v50 = vpop.f32.mrb[5].mxu1  ;;  %v2198_v55 = vsel %vm1583_vm3, %v1808_v49, -inf }
 0x2e3   : > { %2208 = vmax.xlane.f32.xlu0 %v2207_v48  ;;  %v2188_v51 = vpop.f32.mrb[8].mxu0 }
 0x2e4   : > { %v6025_v52 = vpop.f32.mrb[9].mxu0  ;;  %v2213_v58 = vsel %vm1583_vm3, %v2188_v51, -inf }
 0x2e5   : > { %v6690_v46 = vpop.f32.mrb[6].mxu1 }
 0x2e6   : > { %v6010_v47 = vpop.f32.mrb[7].mxu1  ;;  %v2204_v59 = vsel %vm1583_vm3, %v6690_v46, -inf }
 0x2e7   : > { %2199 = vmax.xlane.f32.xlu0 %v2198_v55 }
 0x2e9   : > { %v6693_v56 = vpop.f32.mrb[8].mxu1 }
 0x2ea   : > { %v6020_v57 = vpop.f32.mrb[9].mxu1  ;;  %v2210_v60 = vsel %vm1583_vm3, %v6693_v56, -inf }
 0x2eb   : > { %2214 = vmax.xlane.f32.xlu0 %v2213_v58 }
 0x2f0   : > { %1295 = vrot.lane.b32.xlu1 %v6522_v18, %s6336_s28 }
 0x2f4   : > { %1299 = vrot.lane.b32.xlu1 %v6520_v17, %s6336_s28 }
 0x301   : > { %1291 = vrot.lane.b32.xlu0 %v6517_v16, %s6336_s28 }
 0x318   : > { %2205 = vmax.xlane.f32.xlu1 %v2204_v59 }
 0x31c   : > { %2211 = vmax.xlane.f32.xlu1 %v2210_v60 }
 0x32d   : > { %1289 = vrot.lane.b32.xlu1 %v6507_v14, %s6336_s28 }
 0x368   : > { %v2194_v43 = vpop.xlane.xlu0 %2193 }
 0x369   : > { %v2216_v18 = vsub.f32 %v1656_v30, %v2194_v43 }
 0x36b   : > { %v2224_v44 = vmul.f32 1.442695, %v2216_v18 }
 0x36c   : > { %v2197_v53 = vpop.xlane.xlu1 %2196  ;;  %v2203_v17 = vpop.xlane.xlu0 %2202 }
 0x36d   : > { %6250 = vpow2.f32 %v2224_v44  ;;  %v2217_v54 = vsub.f32 %v1732_v37, %v2197_v53  ;;  %v2219_v16 = vsub.f32 %v1884_v32, %v2203_v17 }
 0x36f   : > { %v2226_v62 = vmul.f32 1.442695, %v2217_v54  ;;  %v2230_v63 = vmul.f32 1.442695, %v2219_v16 }
 0x370   : > { %v2209_v0 = vpop.xlane.xlu0 %2208  ;;  %v1296_v14 = vpop.permute.xlu1 %1295 }
 0x371   : > { %v2221_v1 = vsub.f32 %v2036_v41, %v2209_v0  ;;  %6252 = vpow2.f32 %v2230_v63  ;;  %v1311_v11 = vcombine.low %v1288_v61, %v1296_v14  ;;  %v1312_v2 = vcombine.high %v1288_v61, %v1296_v14 }
 0x372   : > { %6254 = vpow2.f32 %v2226_v62 }
 0x373   : > { %v2234_v4 = vmul.f32 1.442695, %v2221_v1  ;;  %v1319_v29 = vrot.slane %v1311_v11, %v6549_v35  ;;  %v1326_v30 = vrot.slane %v1312_v2, %v6549_v35 }
 0x374   : > { %v2200_v5 = vpop.xlane.xlu0 %2199  ;;  %v1300_v24 = vpop.permute.xlu1 %1299 }
 0x375   : > { %6256 = vpow2.f32 %v2234_v4  ;;  %v2218_v6 = vsub.f32 %v1808_v49, %v2200_v5 }
 0x377   : > { %v6708_v20 = vpop.eup %6250  ;;  %v2228_v7 = vmul.f32 1.442695, %v2218_v6 }
 0x378   : > { %v2240_v8 = vsel %vm1583_vm3, %v6708_v20, 0.0  ;;  %v2215_v9 = vpop.xlane.xlu0 %2214 }
 0x379   : > { %6258 = vpow2.f32 %v2228_v7  ;;  %2241 = vadd.xlane.f32.xlu1 %v2240_v8  ;;  %v2223_v10 = vsub.f32 %v2188_v51, %v2215_v9 }
 0x37b   : > { %v2238_v15 = vmul.f32 1.442695, %v2223_v10  ;;  %v6712_v23 = vpop.eup %6252 }
 0x37c   : > { %v1292_v25 = vpop.permute.xlu0 %1291  ;;  %v6714_v26 = vpop.eup %6254  ;;  %v2249_v27 = vsel %vm1583_vm3, %v6712_v23, 0.0 }
 0x37d   : > { %6260 = vpow2.f32 %v2238_v15  ;;  %v1327_v28 = vcombine.low %v1292_v25, %v1300_v24  ;;  %v1328_v12 = vcombine.high %v1292_v25, %v1300_v24  ;;  %2250 = vadd.xlane.f32.xlu0 %v2249_v27  ;;  %v2243_v34 = vsel %vm1583_vm3, %v6714_v26, 0.0 }
 0x37f   : > { %v6718_v13 = vpop.eup %6256  ;;  %v1335_v32 = vrot.slane %v1327_v28, %v6549_v35  ;;  %v1342_v33 = vrot.slane %v1328_v12, %v6549_v35 }
 0x380   : > { %v2255_v36 = vsel %vm1583_vm3, %v6718_v13, 0.0 }
 0x381   : > { %v1343_v37 = vcombine.low %v1319_v29, %v1335_v32  ;;  %v1344_v38 = vcombine.high %v1319_v29, %v1335_v32  ;;  %v1359_v39 = vcombine.low %v1326_v30, %v1342_v33  ;;  %v1360_v40 = vcombine.high %v1326_v30, %v1342_v33  ;;  %2256 = vadd.xlane.f32.xlu1 %v2255_v36 }
 0x382   : > { %2244 = vadd.xlane.f32.xlu0 %v2243_v34 }
 0x383   : > { %v6728_v41 = vpop.eup %6258  ;;  %v1351_v45 = vrot.slane %v1343_v37, %v6552_v42  ;;  %v1358_v48 = vrot.slane %v1344_v38, %v6552_v42  ;;  %v1367_v49 = vrot.slane %v1359_v39, %v6552_v42  ;;  %v1374_v50 = vrot.slane %v1360_v40, %v6552_v42 }
 0x384   : > { %v2246_v51 = vsel %vm1583_vm3, %v6728_v41, 0.0 }
 0x385   : > { %v1447_v52 = vcombine.low %v1351_v45, %v1358_v48  ;;  %v5547_v47 = vcombine.high %v1351_v45, %v1358_v48  ;;  %v1463_v55 = vcombine.low %v1367_v49, %v1374_v50  ;;  %v5548_v57 = vcombine.high %v1367_v49, %v1374_v50  ;;  %2247 = vadd.xlane.f32.xlu1 %v2246_v51 }
 0x387   : > { %v6736_v58 = vpop.eup %6260  ;;  %v1454_v59 = vrot.slane %v1447_v52, %v6549_v35  ;;  %v1462_v60 = vrot.slane %v5547_v47, %v6549_v35  ;;  %v1470_v61 = vrot.slane %v1463_v55, %v6549_v35  ;;  %v1478_v43 = vrot.slane %v5548_v57, %v6549_v35 }
 0x388   : > { %v2261_v18 = vsel %vm1583_vm3, %v6736_v58, 0.0 }
 0x389   : > { %2262 = vadd.xlane.f32.xlu0 %v2261_v18  ;;  %v1479_v44 = vcombine.low %v1454_v59, %v1462_v60  ;;  %v1495_v53 = vcombine.low %v1470_v61, %v1478_v43  ;;  %v1480_v17 = vcombine.high %v1454_v59, %v1462_v60  ;;  %v1496_v54 = vcombine.high %v1470_v61, %v1478_v43 }
 0x38b   : > { %v1487_v16 = vrot.slane %v1479_v44, %v6552_v42  ;;  %v1503_v62 = vrot.slane %v1495_v53, %v6552_v42  ;;  %v1494_v63 = vrot.slane %v1480_v17, %v6552_v42  ;;  %v1510_v0 = vrot.slane %v1496_v54, %v6552_v42 }
 0x38d   : > { %v1511_v1 = vcombine.low %v1487_v16, %v1503_v62  ;;  %v1512_v4 = vcombine.high %v1487_v16, %v1503_v62  ;;  %v1513_v5 = vcombine.low %v1494_v63, %v1510_v0  ;;  %v1514_v6 = vcombine.high %v1494_v63, %v1510_v0 }
 0x38f   : > { %6027 = vmatpush3.msra.mxu1 %v1511_v1  ;;  %6032 = vmatpush3.msra.mxu0 %v1512_v4 }
 0x390   : > { %6036 = vmatprep.subr.mxu1 %v6330_v3  ;;  %6041 = vmatprep.subr.mxu0 %v6330_v3 }
 0x396   : > { %1297 = vrot.lane.b32.xlu1 %v6536_v21, %s6336_s28 }
 0x39a   : > { %1301 = vrot.lane.b32.xlu1 %v6538_v22, %s6336_s28 }
 0x3a5   : > { %v2206_v14 = vpop.xlane.xlu1 %2205 }
 0x3a6   : > { %v2220_v7 = vsub.f32 %v6690_v46, %v2206_v14 }
 0x3a8   : > { %v2232_v8 = vmul.f32 1.442695, %v2220_v7 }
 0x3a9   : > { %v2212_v9 = vpop.xlane.xlu1 %2211 }
 0x3aa   : > { %6262 = vpow2.f32 %v2232_v8  ;;  %v2222_v10 = vsub.f32 %v6693_v56, %v2212_v9 }
 0x3ac   : > { %v2236_v11 = vmul.f32 1.442695, %v2222_v10 }
 0x3ad   : > { %v1290_v46 = vpop.permute.xlu1 %1289 }
 0x3ae   : > { %6264 = vpow2.f32 %v2236_v11 }
 0x3b4   : > { %v6756_v2 = vpop.eup %6262 }
 0x3b5   : > { %v2252_v15 = vsel %vm1583_vm3, %v6756_v2, 0.0 }
 0x3b6   : > { %2253 = vadd.xlane.f32.xlu0 %v2252_v15 }
 0x3b8   : > { %v6760_v21 = vpop.eup %6264 }
 0x3b9   : > { %v2258_v22 = vsel %vm1583_vm3, %v6760_v21, 0.0 }
 0x3ba   : > { %2259 = vadd.xlane.f32.xlu0 %v2258_v22 }
 0x3d0   : > { %1293 = vrot.lane.b32.xlu0 %v6529_v19, %s6336_s28  ;;  %s7230_s28 = scalar_lea.vmem %s7208_s6, %s6427_s27 }
 0x406   : > { %v2242_v24 = vpop.xlane.xlu1 %2241 }
 0x407   : > { %6266 = vrcp.f32 %v2242_v24 }
 0x40a   : > { %v2251_v56 = vpop.xlane.xlu0 %2250 }
 0x40e   : > { %v2257_v25 = vpop.xlane.xlu1 %2256 }
 0x40f   : > { %v2245_v27 = vpop.xlane.xlu0 %2244 }
 0x410   : > { %6268 = vrcp.f32 %v2245_v27 }
 0x411   : > { %v6267_v28 = vpop.eup %6266  ;;  %6270 = vrcp.f32 %v2251_v56 }
 0x412   : > { %v2265_v12 = vmul.f32 %v6267_v28, %v6708_v20  ;;  %v2248_v29 = vpop.xlane.xlu1 %2247 }
 0x413   : > { %6272 = vrcp.f32 %v2248_v29 }
 0x414   : > { %6029 = vmatmul.mubr.msk.f32.vlgmr.msra.gmra.mrb[10].mxu1 %vm1583_vm3, %v2265_v12  ;;  %6274 = vrcp.f32 %v2257_v25 }
 0x415   : > { %6037 = vmatpush3.msra.mxu1 %v1513_v5  ;;  %6038 = vmatprep.mubr.msk.f32.mxu1 %vm6331_vm1, %v6330_v3 }
 0x416   : > { %6046 = vmatprep.subr.mxu1 %v6330_v3  ;;  %v1298_v37 = vpop.permute.xlu1 %1297 }
 0x417   : > { %v1379_v39 = vcombine.low %v1290_v46, %v1298_v37  ;;  %v1380_v40 = vcombine.high %v1290_v46, %v1298_v37 }
 0x419   : > { %v1387_v49 = vrot.slane %v1379_v39, %v6549_v35  ;;  %v1394_v50 = vrot.slane %v1380_v40, %v6549_v35 }
 0x41a   : > { %v6269_v19 = vpop.eup %6268 }
 0x41b   : > { %v2267_v30 = vmul.f32 %v6269_v19, %v6714_v26  ;;  %v6271_v32 = vpop.eup %6270  ;;  %v2263_v26 = vpop.xlane.xlu0 %2262 }
 0x41c   : > { %v2271_v34 = vmul.f32 %v6271_v32, %v6712_v23 }
 0x41d   : > { %v6273_v33 = vpop.eup %6272  ;;  %6034 = vmatmul.mubr.msk.f32.vlgmr.msra.gmra.mrb[10].mxu0 %vm1583_vm3, %v2267_v30 }
 0x41e   : > { %v2269_v20 = vmul.f32 %v6273_v33, %v6728_v41  ;;  %6042 = vmatpush3.msra.mxu0 %v1514_v6  ;;  %6043 = vmatprep.mubr.msk.f32.mxu0 %vm6331_vm1, %v6330_v3  ;;  %v1302_v41 = vpop.permute.xlu1 %1301  ;;  %v6275_v1 = vpop.eup %6274 }
 0x41f   : > { %6051 = vmatprep.subr.mxu0 %v6330_v3  ;;  %v2275_v56 = vmul.f32 %v6275_v1, %v6718_v13 }
 0x420   : > { %6039 = vmatmul.mubr.msk.f32.vlgmr.msra.gmra.mrb[12].mxu1 %vm1583_vm3, %v2269_v20 }
 0x421   : > { %6044 = vmatmul.mubr.msk.f32.vlgmr.msra.gmra.mrb[12].mxu0 %vm1583_vm3, %v2271_v34  ;;  %6048 = vmatprep.mubr.msk.f32.mxu1 %vm6331_vm1, %v6330_v3 }
 0x422   : > { %6053 = vmatprep.mubr.msk.f32.mxu0 %vm6331_vm1, %v6330_v3 }
 0x443   : > { %v2254_v36 = vpop.xlane.xlu0 %2253 }
 0x444   : > { %6276 = vrcp.f32 %v2254_v36 }
 0x445   : > { %6278 = vrcp.f32 %v2263_v26 }
 0x447   : > { %v2260_v38 = vpop.xlane.xlu0 %2259 }
 0x448   : > { %6280 = vrcp.f32 %v2260_v38 }
 0x44b   : > { %v1294_v23 = vpop.permute.xlu0 %1293 }
 0x44c   : > { %v1395_v45 = vcombine.low %v1294_v23, %v1302_v41  ;;  %v1396_v48 = vcombine.high %v1294_v23, %v1302_v41 }
 0x44e   : > { %v1403_v51 = vrot.slane %v1395_v45, %v6549_v35  ;;  %v1410_v52 = vrot.slane %v1396_v48, %v6549_v35  ;;  %v6277_v7 = vpop.eup %6276 }
 0x44f   : > { %v6279_v10 = vpop.eup %6278  ;;  %v2273_v25 = vmul.f32 %v6277_v7, %v6756_v2 }
 0x450   : > { %v1411_v47 = vcombine.low %v1387_v49, %v1403_v51  ;;  %v1412_v55 = vcombine.high %v1387_v49, %v1403_v51  ;;  %v1427_v57 = vcombine.low %v1394_v50, %v1410_v52  ;;  %v1428_v59 = vcombine.high %v1394_v50, %v1410_v52 }
 0x451   : > { %v2279_v12 = vmul.f32 %v6279_v10, %v6736_v58 }
 0x452   : > { %v1419_v60 = vrot.slane %v1411_v47, %v6552_v42  ;;  %v1426_v61 = vrot.slane %v1412_v55, %v6552_v42  ;;  %v1435_v43 = vrot.slane %v1427_v57, %v6552_v42  ;;  %v1442_v18 = vrot.slane %v1428_v59, %v6552_v42  ;;  %v6281_v24 = vpop.eup %6280 }
 0x453   : > { %v2277_v29 = vmul.f32 %v6281_v24, %v6760_v21 }
 0x454   : > { %v1515_v44 = vcombine.low %v1419_v60, %v1426_v61  ;;  %v5549_v53 = vcombine.high %v1419_v60, %v1426_v61  ;;  %v1531_v17 = vcombine.low %v1435_v43, %v1442_v18  ;;  %v5550_v54 = vcombine.high %v1435_v43, %v1442_v18 }
 0x456   : > { %v1522_v16 = vrot.slane %v1515_v44, %v6549_v35  ;;  %v1530_v62 = vrot.slane %v5549_v53, %v6549_v35  ;;  %v1538_v63 = vrot.slane %v1531_v17, %v6549_v35  ;;  %v1546_v0 = vrot.slane %v5550_v54, %v6549_v35 }
 0x458   : > { %v1547_v4 = vcombine.low %v1522_v16, %v1530_v62  ;;  %v1563_v5 = vcombine.low %v1538_v63, %v1546_v0  ;;  %v1548_v6 = vcombine.high %v1522_v16, %v1530_v62  ;;  %v1564_v14 = vcombine.high %v1538_v63, %v1546_v0 }
 0x45a   : > { %v1555_v8 = vrot.slane %v1547_v4, %v6552_v42  ;;  %v1571_v9 = vrot.slane %v1563_v5, %v6552_v42  ;;  %v1562_v11 = vrot.slane %v1548_v6, %v6552_v42  ;;  %v1578_v15 = vrot.slane %v1564_v14, %v6552_v42 }
 0x45c   : > { %v1579_v22 = vcombine.low %v1555_v8, %v1571_v9  ;;  %v1580_v46 = vcombine.high %v1555_v8, %v1571_v9  ;;  %v1581_v27 = vcombine.low %v1562_v11, %v1578_v15  ;;  %v1582_v28 = vcombine.high %v1562_v11, %v1578_v15 }
 0x45e   : > { %6047 = vmatpush3.msra.mxu1 %v1579_v22  ;;  %6052 = vmatpush3.msra.mxu0 %v1580_v46 }
 0x45f   : > { %6049 = vmatmul.mubr.msk.f32.vlgmr.msra.gmra.mrb[14].mxu1 %vm1583_vm3, %v2273_v25  ;;  %6054 = vmatmul.mubr.msk.f32.vlgmr.msra.gmra.mrb[14].mxu0 %vm1583_vm3, %v2275_v56 }
 0x460   : > { %6056 = vmatprep.subr.mxu1 %v6330_v3  ;;  %6061 = vmatprep.subr.mxu0 %v6330_v3 }
 0x461   : > { %6057 = vmatpush3.msra.mxu1 %v1581_v27  ;;  %6062 = vmatpush3.msra.mxu0 %v1582_v28 }
 0x462   : > { %6058 = vmatprep.mubr.msk.f32.mxu1 %vm6331_vm1, %v6330_v3  ;;  %6063 = vmatprep.mubr.msk.f32.mxu0 %vm6331_vm1, %v6330_v3 }
 0x463   : > { %6059 = vmatmul.mubr.msk.f32.vlgmr.msra.gmra.mrb[16].mxu1 %vm1583_vm3, %v2277_v29  ;;  %6064 = vmatmul.mubr.msk.f32.vlgmr.msra.gmra.mrb[16].mxu0 %vm1583_vm3, %v2279_v12 }
 0x464   : > { %6066 = vmatprep.subr.bf16.mxu1 %v6330_v3  ;;  %6070 = vmatprep.mubr.msk.bf16.mxu1 %vm6331_vm1, %v6330_v3 }
 0x4e7   : > { %v2349_v13 = vpop.f32.mrb[10].mxu1 }
 0x4e8   : > { %v6030_v58 = vpop.f32.mrb[11].mxu1 }
 0x4f0   : > { %v2422_v2 = vpop.f32.mrb[10].mxu0 }
 0x4f1   : > { %v6035_v21 = vpop.f32.mrb[11].mxu0 }
 0x4f3   : > { %v2495_v19 = vpop.f32.mrb[12].mxu1 }
 0x4f4   : > { %v2568_v30 = vpop.f32.mrb[12].mxu0  ;;  %v2864_v32 = vcombine.low %v2349_v13, %v2495_v19  ;;  %v2865_v33 = vcombine.high %v2349_v13, %v2495_v19  ;;  %v6040_v20 = vpop.f32.mrb[13].mxu1 }
 0x4f5   : > { %v2880_v34 = vcombine.low %v2422_v2, %v2568_v30  ;;  %v2881_v26 = vcombine.high %v2422_v2, %v2568_v30  ;;  %v6045_v36 = vpop.f32.mrb[13].mxu0 }
 0x4f6   : > { %v2872_v37 = vrot.slane %v2864_v32, %v6549_v35  ;;  %v2879_v38 = vrot.slane %v2865_v33, %v6549_v35 }
 0x4f7   : > { %v2888_v39 = vrot.slane %v2880_v34, %v6549_v35  ;;  %v2895_v40 = vrot.slane %v2881_v26, %v6549_v35 }
 0x4f9   : > { %v2896_v41 = vcombine.low %v2872_v37, %v2888_v39  ;;  %v2897_v23 = vcombine.high %v2872_v37, %v2888_v39  ;;  %v2912_v45 = vcombine.low %v2879_v38, %v2895_v40  ;;  %v2913_v48 = vcombine.high %v2879_v38, %v2895_v40  ;;  %v6120_v37 = vld [vmem:[%s6440_s20] sm:$0xff]  }
 0x4fa   : > { %6067 = vmatpush3.bf16.msra.mxu1 %v6120_v37 }
 0x4fb   : > { %v2904_v49 = vrot.slane %v2896_v41, %v6552_v42  ;;  %v2911_v50 = vrot.slane %v2897_v23, %v6552_v42  ;;  %v2920_v51 = vrot.slane %v2912_v45, %v6552_v42  ;;  %v2927_v52 = vrot.slane %v2913_v48, %v6552_v42  ;;  %6068 = vmatprep.subr.bf16.mxu1 %v6330_v3 }
 0x4fd   : > { %v3000_v47 = vcombine.low %v2904_v49, %v2911_v50  ;;  %v5575_v55 = vcombine.high %v2904_v49, %v2911_v50  ;;  %v3016_v57 = vcombine.low %v2920_v51, %v2927_v52  ;;  %v5576_v59 = vcombine.high %v2920_v51, %v2927_v52 }
 0x4ff   : > { %v3007_v60 = vrot.slane %v3000_v47, %v6549_v35  ;;  %v3015_v61 = vrot.slane %v5575_v55, %v6549_v35  ;;  %v3023_v43 = vrot.slane %v3016_v57, %v6549_v35  ;;  %v3031_v18 = vrot.slane %v5576_v59, %v6549_v35  ;;  %v6121_v55 = vld [vmem:[%s6440_s20 + $0x8] sm:$0xff]   ;;  %s6343_s20 = smov [#allocation2]  }
 0x500   : > { %6069 = vmatpush3.bf16.msra.mxu1 %v6121_v55  ;;  %v6342_v55 = vmov 0   ;;  %s5368_s17 = sshll.u32 %s6343_s20, 4  ;;  %s5369_s17 = int_to_ptr.vmem [resolvable:$true] %s5368_s17 }
 0x501   : > { %v3033_v44 = vcombine.high %v3007_v60, %v3015_v61  ;;  %v3049_v53 = vcombine.high %v3023_v43, %v3031_v18  ;;  %v3032_v17 = vcombine.low %v3007_v60, %v3015_v61  ;;  %v3048_v54 = vcombine.low %v3023_v43, %v3031_v18  ;;  %3595 = vmatprep.mubr.bf16.mxu0 %v6342_v55  ;;  %p6299_p9 = scmp.lt.s32.totalorder %s5369_s17, %s5369_s17 }
 0x503   : > { %v3047_v16 = vrot.slane %v3033_v44, %v6552_v42  ;;  %v3063_v62 = vrot.slane %v3049_v53, %v6552_v42  ;;  %v6832_v63 = vrot.slane %v3032_v17, %v6552_v42  ;;  %v6835_v0 = vrot.slane %v3048_v54, %v6552_v42 }
 0x505   : > { %v3066_v1 = vcombine.low %v3047_v16, %v3063_v62  ;;  %v3064_v4 = vcombine.low %v6832_v63, %v6835_v0  ;;  %v3065_v5 = vcombine.high %v6832_v63, %v6835_v0  ;;  %v3067_v6 = vcombine.high %v3047_v16, %v3063_v62  ;;  %v5579_v63 = vld [vmem:[%s7228_s30] ss:$0 sm:$0xff] }
 0x532   : > { %v2641_v14 = vpop.f32.mrb[14].mxu1  ;;  %v2714_v7 = vpop.f32.mrb[14].mxu0 }
 0x533   : > { %v6050_v8 = vpop.f32.mrb[15].mxu1  ;;  %v6055_v9 = vpop.f32.mrb[15].mxu0 }
 0x536   : > { %v2787_v10 = vpop.f32.mrb[16].mxu1  ;;  %v2860_v11 = vpop.f32.mrb[16].mxu0 }
 0x537   : > { %v2932_v15 = vcombine.low %v2641_v14, %v2787_v10  ;;  %v2933_v22 = vcombine.high %v2641_v14, %v2787_v10  ;;  %v2948_v46 = vcombine.low %v2714_v7, %v2860_v11  ;;  %v2949_v24 = vcombine.high %v2714_v7, %v2860_v11  ;;  %v6060_v56 = vpop.f32.mrb[17].mxu1  ;;  %v6065_v25 = vpop.f32.mrb[17].mxu0 }
 0x539   : > { %v2940_v27 = vrot.slane %v2932_v15, %v6549_v35  ;;  %v2947_v28 = vrot.slane %v2933_v22, %v6549_v35  ;;  %v2956_v12 = vrot.slane %v2948_v46, %v6549_v35  ;;  %v2963_v29 = vrot.slane %v2949_v24, %v6549_v35  ;;  %v6290_v24 = vld [vmem:[#allocation2] sm:$0xff] }
 0x53b   : > { %v2964_v13 = vcombine.low %v2940_v27, %v2956_v12  ;;  %v2965_v58 = vcombine.high %v2940_v27, %v2956_v12  ;;  %v2980_v2 = vcombine.low %v2947_v28, %v2963_v29  ;;  %v2981_v21 = vcombine.high %v2947_v28, %v2963_v29  ;;  %v6291_v27 = vld [vmem:[#allocation2 + $0x8] sm:$0xff] }
 0x53d   : > { %v2972_v19 = vrot.slane %v2964_v13, %v6552_v42  ;;  %v2979_v30 = vrot.slane %v2965_v58, %v6552_v42  ;;  %v2988_v32 = vrot.slane %v2980_v2, %v6552_v42  ;;  %v2995_v33 = vrot.slane %v2981_v21, %v6552_v42 }
 0x53f   : > { %v3068_v20 = vcombine.low %v2972_v19, %v2979_v30  ;;  %v5577_v34 = vcombine.high %v2972_v19, %v2979_v30  ;;  %v3084_v26 = vcombine.low %v2988_v32, %v2995_v33  ;;  %v5578_v36 = vcombine.high %v2988_v32, %v2995_v33 }
 0x541   : > { %v3075_v38 = vrot.slane %v3068_v20, %v6549_v35  ;;  %v3083_v39 = vrot.slane %v5577_v34, %v6549_v35  ;;  %v3091_v40 = vrot.slane %v3084_v26, %v6549_v35  ;;  %v3099_v41 = vrot.slane %v5578_v36, %v6549_v35  ;;  %v3283_v34 = vld [vmem:[%s6458_s1] sm:$0xff]  ;;  %v3284_v36 = vld [vmem:[%s6458_s1 + $0x8] sm:$0xff] }
 0x542   : > { %v3291_v26 = vld [vmem:[%s6458_s1 + $0x40] sm:$0xff] }
 0x543   : > { %v3101_v23 = vcombine.high %v3075_v38, %v3083_v39  ;;  %v3117_v45 = vcombine.high %v3091_v40, %v3099_v41  ;;  %v3100_v48 = vcombine.low %v3075_v38, %v3083_v39  ;;  %v3116_v49 = vcombine.low %v3091_v40, %v3099_v41  ;;  %v3292_v38 = vld [vmem:[%s6458_s1 + $0x48] sm:$0xff] }
 0x544   : > { %v5586_v37 = vcombine.high %v3283_v34, %v3291_v26  ;;  %v5585_v39 = vcombine.low %v3283_v34, %v3291_v26  ;;  %v5587_v40 = vcombine.low %v3284_v36, %v3292_v38  ;;  %v5588_v41 = vcombine.high %v3284_v36, %v3292_v38  ;;  %v3289_v26 = vld [vmem:[%s6458_s1 + $0x30] sm:$0xff]  ;;  %v3298_v38 = vld [vmem:[%s6458_s1 + $0x78] sm:$0xff] }
 0x545   : > { %v3115_v50 = vrot.slane %v3101_v23, %v6552_v42  ;;  %v3131_v51 = vrot.slane %v3117_v45, %v6552_v42  ;;  %v3108_v52 = vrot.slane %v3100_v48, %v6552_v42  ;;  %v3124_v47 = vrot.slane %v3116_v49, %v6552_v42  ;;  %v3299_v23 = vld [vmem:[%s6458_s1 + $0x80] sm:$0xff]  ;;  %v3300_v48 = vld [vmem:[%s6458_s1 + $0x88] sm:$0xff]  ;;  %v3297_v36 = vld [vmem:[%s6458_s1 + $0x70] sm:$0xff] }
 0x546   : > { %3563 = vmatprep.subr.bf16.mxu0 %v5586_v37  ;;  %3606 = vmatprep.subr.bf16.mxu1 %v5588_v41  ;;  %v3307_v45 = vld [vmem:[%s6458_s1 + $0xc0] sm:$0xff]  ;;  %v3290_v37 = vld [vmem:[%s6458_s1 + $0x38] sm:$0xff]  ;;  %v5598_v41 = vcombine.high %v3289_v26, %v3297_v36 }
 0x547   : > { %v3134_v57 = vcombine.low %v3115_v50, %v3131_v51  ;;  %v3133_v59 = vcombine.high %v3108_v52, %v3124_v47  ;;  %v3132_v60 = vcombine.low %v3108_v52, %v3124_v47  ;;  %v3135_v35 = vcombine.high %v3115_v50, %v3131_v51  ;;  %3564 = vmatpush1.bf16.msra.mxu0 %v5585_v39  ;;  %v3308_v50 = vld [vmem:[%s6458_s1 + $0xc8] sm:$0xff] }
 0x548   : > { %v5602_v49 = vcombine.high %v3299_v23, %v3307_v45  ;;  %v5601_v51 = vcombine.low %v3299_v23, %v3307_v45  ;;  %v5603_v52 = vcombine.low %v3300_v48, %v3308_v50  ;;  %v5604_v47 = vcombine.high %v3300_v48, %v3308_v50  ;;  %v3305_v45 = vld [vmem:[%s6458_s1 + $0xb0] sm:$0xff]  ;;  %v3314_v50 = vld [vmem:[%s6458_s1 + $0xf8] sm:$0xff] }
 0x549   : > { %v6108_v61 = vpack.i.bf16 %v3134_v57, %v3066_v1  ;;  %v6103_v43 = vpack.i.bf16 %v3133_v59, %v3065_v5  ;;  %v6113_v18 = vpack.i.bf16 %v3135_v35, %v3067_v6  ;;  %v3285_v57 = vld [vmem:[%s6458_s1 + $0x10] sm:$0xff]  ;;  %v5600_v23 = vcombine.high %v3290_v37, %v3298_v38 }
 0x54a   : > { %3565 = vmatprep.subr.bf16.mxu0 %v5602_v49  ;;  %v3293_v59 = vld [vmem:[%s6458_s1 + $0x50] sm:$0xff]  ;;  %v3306_v49 = vld [vmem:[%s6458_s1 + $0xb8] sm:$0xff] }
 0x54b   : > { %6109 = vrot.lane.b32.xlu1 %v6108_v61, %s6339_s19  ;;  %6104 = vrot.lane.b32.xlu0 %v6103_v43, %s6340_s22  ;;  %v5589_v35 = vcombine.low %v3285_v57, %v3293_v59  ;;  %v5590_v61 = vcombine.high %v3285_v57, %v3293_v59  ;;  %v3294_v43 = vld [vmem:[%s6458_s1 + $0x58] sm:$0xff]  ;;  %v3313_v48 = vld [vmem:[%s6458_s1 + $0xf0] sm:$0xff]  ;;  %v5616_v57 = vcombine.high %v3306_v49, %v3314_v50 }
 0x54c   : > { %3566 = vmatpush1.bf16.msra.mxu0 %v5601_v51  ;;  %v5597_v51 = vcombine.low %v3289_v26, %v3297_v36  ;;  %v5613_v59 = vcombine.low %v3305_v45, %v3313_v48 }
 0x54d   : > { %3649 = vmatprep.subr.bf16.mxu0 %v5590_v61  ;;  %v6123_v61 = vld [vmem:[%s6473_s0 + $0xc0] sm:$0xff]  }
 0x54f   : > { %6114 = vrot.lane.b32.xlu0 %v6113_v18, %s6341_s13 }
 0x5bd   : > { %v6110_v3 = vpop.permute.xlu1 %6109  ;;  %v6105_v44 = vpop.permute.xlu0 %6104 }
 0x5be   : > { %v6107_v53 = vunpack.i.h.bf16 %v6105_v44  ;;  %v6106_v42 = vunpack.i.l.bf16 %v6105_v44  ;;  %v6112_v17 = vunpack.i.h.bf16 %v6110_v3  ;;  %v6111_v54 = vunpack.i.l.bf16 %v6110_v3 }
 0x5c0   : > { %v3160_v16 = vsel %vm1583_vm3, %v3064_v4, %v6106_v42  ;;  %v3161_v62 = vsel %vm1583_vm3, %v3132_v60, %v6107_v53  ;;  %v3286_v60 = vld [vmem:[%s6458_s1 + $0x18] sm:$0xff] }
 0x5c1   : > { %v6115_v1 = vpop.permute.xlu0 %6114  ;;  %v3163_v14 = vsel %vm3162_vm4, %v3160_v16, %v6111_v54  ;;  %v3164_v7 = vsel %vm3162_vm4, %v3161_v62, %v6112_v17  ;;  %v5591_v18 = vcombine.low %v3286_v60, %v3294_v43  ;;  %v5592_v3 = vcombine.high %v3286_v60, %v3294_v43  ;;  %v6124_v43 = vld [vmem:[%s6473_s0] sm:$0xff]  }
 0x5c2   : > { %v6117_v5 = vunpack.i.h.bf16 %v6115_v1  ;;  %v6116_v6 = vunpack.i.l.bf16 %v6115_v1  ;;  %v5583_v1 = vld [vmem:[%s7229_s29] ss:$0 sm:$0xff]  ;;  %v5615_v60 = vcombine.low %v3306_v49, %v3314_v50 }
 0x5c4   : > { %v3166_v8 = vsel %vm3165_vm5, %v3163_v14, %v6116_v6  ;;  %v3167_v9 = vsel %vm3165_vm5, %v3164_v7, %v6117_v5 }
 0x5c5   : > { %v3173_v10 = vpack.c.bf16 %v3167_v9, %v3166_v8  ;;  %v5584_v8 = vld [vmem:[%s7230_s28] ss:$0 sm:$0xff] }
 0x5c7   : > { %6071 = vmatmul.mubr.msk.bf16.vlgmr.msra.gmra.mrb[20].mxu1 %vm638_vm2, %v3173_v10  ;;  %v3301_v10 = vld [vmem:[%s6458_s1 + $0x90] sm:$0xff] }
 0x5c8   : > { %3607 = vmatpush1.bf16.msra.mxu1 %v5587_v40  ;;  %3638 = vmatprep.mubr.bf16.mxu1 %v6342_v55 }
 0x5c9   : > { %3608 = vmatprep.subr.bf16.mxu1 %v5604_v47  ;;  %v5614_v47 = vcombine.high %v3305_v45, %v3313_v48 }
 0x5cc   : > { %3609 = vmatpush1.bf16.msra.mxu1 %v5603_v52  ;;  %v5599_v52 = vcombine.low %v3290_v37, %v3298_v38  ;;  %v3338_v38 = vsub.s32 4, %v6546_v31 }
 0x5cd   : > { %3692 = vmatprep.subr.bf16.mxu1 %v5592_v3  ;;  %v6126_v3 = vld [vmem:[%s6473_s0 + $0x48] sm:$0xff]  }
 0x69a   : > { %v3229_v0 = vpop.f32.mrb[20].mxu1 }
 0x69b   : > { %v3230_v4 = vadd.f32 %v5579_v63, %v3229_v0  ;;  %v6072_v11 = vpop.f32.mrb[21].mxu1  ;;  %v3302_v0 = vld [vmem:[%s6458_s1 + $0x98] sm:$0xff] }
 0x69c   : > { %v3232_v15 = vpop.f32.mrb[22].mxu1 }
 0x69d   : > { %v3233_v22 = vadd.f32 %v5579_v63, %v3232_v15  ;;  %v6073_v46 = vpop.f32.mrb[23].mxu1  ;;  %v3236_v56 = vadd.f32 %v6290_v24, %v3230_v4  ;;  %v3309_v63 = vld [vmem:[%s6458_s1 + $0xd0] sm:$0xff]  ;;  %v3310_v4 = vld [vmem:[%s6458_s1 + $0xd8] sm:$0xff] }
 0x69e   : > { %v5606_v46 = vcombine.high %v3301_v10, %v3309_v63  ;;  %v5608_v24 = vcombine.high %v3302_v0, %v3310_v4 }
 0x69f   : > { %v3240_v25 = vsel %vm638_vm2, %v3236_v56, 0.0  ;;  %v3237_v28 = vadd.f32 %v6291_v27, %v3233_v22  ;;  %v3288_v27 = vld [vmem:[%s6458_s1 + $0x28] sm:$0xff] }
 0x6a0   : > { %3241 = vadd.xlane.f32.xlu1 %v3240_v25  ;;  %v3295_v25 = vld [vmem:[%s6458_s1 + $0x60] sm:$0xff] }
 0x6a1   : > { %v3243_v12 = vsel %vm638_vm2, %v3237_v28, 0.0 }
 0x6a2   : > { %3244 = vadd.xlane.f32.xlu0 %v3243_v12  ;;  %v5605_v12 = vcombine.low %v3301_v10, %v3309_v63  ;;  %v6142_v10 = vld [vmem:[%s6473_s0 + $0x68] sm:$0xff]  }
 0x6a3   : > { %v6143_v63 = vld [vmem:[%s6473_s0 + $0xe8] sm:$0xff]  }
 0x72d   : > { %v3242_v29 = vpop.xlane.xlu1 %3241 }
 0x72e   : > { %v3247_v13 = vmul.f32 0.03125, %v3242_v29  ;;  %v5607_v29 = vcombine.low %v3302_v0, %v3310_v4  ;;  %v6144_v0 = vld [vmem:[%s6473_s0 + $0x28] sm:$0xff]  }
 0x72f   : > { %v3245_v58 = vpop.xlane.xlu0 %3244  ;;  %v6145_v4 = vld [vmem:[%s6473_s0 + $0xa8] sm:$0xff]  }
 0x730   : > { %v3249_v2 = vsub.f32 %v3236_v56, %v3247_v13  ;;  %v3248_v21 = vmul.f32 0.03125, %v3245_v58  ;;  %v3287_v56 = vld [vmem:[%s6458_s1 + $0x20] sm:$0xff] }
 0x731   : > { %v5594_v13 = vcombine.high %v3287_v56, %v3295_v25 }
 0x732   : > { %v3250_v19 = vsub.f32 %v3237_v28, %v3248_v21  ;;  %v3251_v30 = vmul.f32 %v3249_v2, %v3249_v2  ;;  %v3296_v28 = vld [vmem:[%s6458_s1 + $0x68] sm:$0xff]  ;;  %v3311_v21 = vld [vmem:[%s6458_s1 + $0xe0] sm:$0xff] }
 0x733   : > { %v5596_v58 = vcombine.high %v3288_v27, %v3296_v28 }
 0x734   : > { %v3253_v32 = vsel %vm638_vm2, %v3251_v30, 0.0  ;;  %v3252_v33 = vmul.f32 %v3250_v19, %v3250_v19  ;;  %v3312_v30 = vld [vmem:[%s6458_s1 + $0xe8] sm:$0xff] }
 0x735   : > { %3254 = vadd.xlane.f32.xlu0 %v3253_v32  ;;  %v5593_v32 = vcombine.low %v3287_v56, %v3295_v25  ;;  %v6149_v56 = vld [vmem:[%s6473_s0 + $0xb0] sm:$0xff]   ;;  %v6150_v25 = vld [vmem:[%s6473_s0 + $0x78] sm:$0xff]  }
 0x736   : > { %v3256_v20 = vsel %vm638_vm2, %v3252_v33, 0.0  ;;  %v5595_v33 = vcombine.low %v3288_v27, %v3296_v28  ;;  %v6151_v27 = vld [vmem:[%s6473_s0 + $0xf8] sm:$0xff]  }
 0x737   : > { %3257 = vadd.xlane.f32.xlu1 %v3256_v20  ;;  %v6152_v28 = vld [vmem:[%s6473_s0 + $0x38] sm:$0xff]  }
 0x7c2   : > { %v3255_v44 = vpop.xlane.xlu0 %3254 }
 0x7c3   : > { %v3259_v53 = vmul.f32 0.03125, %v3255_v44  ;;  %v6127_v44 = vld [vmem:[%s6473_s0 + $0xc8] sm:$0xff]  }
 0x7c4   : > { %v3258_v42 = vpop.xlane.xlu1 %3257 }
 0x7c5   : > { %v3261_v17 = vadd.f32 1e-05, %v3259_v53  ;;  %v3260_v54 = vmul.f32 0.03125, %v3258_v42  ;;  %v6129_v53 = vld [vmem:[%s6473_s0 + $0x88] sm:$0xff]   ;;  %v6130_v42 = vld [vmem:[%s6473_s0 + $0x50] sm:$0xff]  }
 0x7c7   : > { %6282 = vrsqrt.f32 %v3261_v17  ;;  %v3262_v16 = vadd.f32 1e-05, %v3260_v54  ;;  %v6131_v17 = vld [vmem:[%s6473_s0 + $0xd0] sm:$0xff]  }
 0x7c8   : > { %v6132_v54 = vld [vmem:[%s6473_s0 + $0x10] sm:$0xff]  }
 0x7c9   : > { %6284 = vrsqrt.f32 %v3262_v16  ;;  %v6133_v16 = vld [vmem:[%s6473_s0 + $0x90] sm:$0xff]  }
 0x7d1   : > { %v6283_v62 = vpop.eup %6282 }
 0x7d2   : > { %v3265_v5 = vmul.f32 %v6283_v62, %v3249_v2  ;;  %v3303_v2 = vld [vmem:[%s6458_s1 + $0xa0] sm:$0xff]  ;;  %v6134_v62 = vld [vmem:[%s6473_s0 + $0x58] sm:$0xff]  }
 0x7d3   : > { %v6285_v6 = vpop.eup %6284  ;;  %v5610_v20 = vcombine.high %v3303_v2, %v3311_v21  ;;  %v5609_v39 = vcombine.low %v3303_v2, %v3311_v21  ;;  %v6986_v2 = vld [vmem:[%s6463_s3 + $0x8] sm:$0xff] }
 0x7d4   : > { %v3273_v14 = vmul.f32 %v5583_v1, %v3265_v5  ;;  %v3266_v7 = vmul.f32 %v6285_v6, %v3250_v19  ;;  %v3304_v19 = vld [vmem:[%s6458_s1 + $0xa8] sm:$0xff]  ;;  %v6136_v5 = vld [vmem:[%s6473_s0 + $0x18] sm:$0xff]  }
 0x7d5   : > { %v5612_v34 = vcombine.high %v3304_v19, %v3312_v30  ;;  %v5611_v40 = vcombine.low %v3304_v19, %v3312_v30  ;;  %v6137_v6 = vld [vmem:[%s6473_s0 + $0x98] sm:$0xff]   ;;  %v3322_v19 = vsub.s32 0, %v6546_v31  ;;  %v3330_v30 = vsub.s32 2, %v6546_v31 }
 0x7d6   : > { %v3274_v9 = vmul.f32 %v5583_v1, %v3266_v7  ;;  %v6904_v11 = vadd.f32 %v5584_v8, %v3273_v14  ;;  %v6135_v1 = vld [vmem:[%s6473_s0 + $0xd8] sm:$0xff]   ;;  %v6138_v14 = vld [vmem:[%s6473_s0 + $0x60] sm:$0xff]  }
 0x7d7   : > { %v6139_v7 = vld [vmem:[%s6473_s0 + $0xe0] sm:$0xff]  }
 0x7d8   : > { %v6906_v15 = vadd.f32 %v5584_v8, %v3274_v9  ;;  %v6140_v8 = vld [vmem:[%s6473_s0 + $0x20] sm:$0xff]  }
 0x7d9   : > { %v6141_v9 = vld [vmem:[%s6473_s0 + $0xa0] sm:$0xff]  }
 0x7da   : > { %v6910_v22 = vpack.c.bf16 %v6906_v15, %v6904_v11 }
 0x7dc   : > { %5617 = vmatmul.mubr.msk.bf16.vlgmr.msra.gmra.mrb[20].mxu0 %vm638_vm2, %v6910_v22  ;;  %5618 = vmatmul.mubr.msk.bf16.vlgmr.msra.gmra.mrb[24].mxu1 %vm638_vm2, %v6910_v22 }
 0x7dd   : > { %3650 = vmatpush1.bf16.msra.mxu0 %v5589_v35  ;;  %3693 = vmatpush1.bf16.msra.mxu1 %v5591_v18  ;;  %v6122_v35 = vld [vmem:[%s6473_s0 + $0x40] sm:$0xff]  }
 0x7de   : > { %3651 = vmatprep.subr.bf16.mxu0 %v5606_v46  ;;  %3694 = vmatprep.subr.bf16.mxu1 %v5608_v24  ;;  %v6125_v18 = vld [vmem:[%s6473_s0 + $0x80] sm:$0xff]   ;;  %v6147_v46 = vld [vmem:[%s6473_s0 + $0xf0] sm:$0xff]  }
 0x7df   : > { %3681 = vmatprep.mubr.bf16.mxu0 %v6342_v55  ;;  %3724 = vmatprep.mubr.bf16.mxu1 %v6342_v55  ;;  %v6148_v24 = vld [vmem:[%s6473_s0 + $0x30] sm:$0xff]  }
 0x7e1   : > { %3652 = vmatpush1.bf16.msra.mxu0 %v5605_v12  ;;  %3695 = vmatpush1.bf16.msra.mxu1 %v5607_v29  ;;  %v6153_v12 = vld [vmem:[%s6473_s0 + $0xb8] sm:$0xff]   ;;  %v6154_v29 = vld [vmem:[%s6473_s0 + $0x140] sm:$0xff]  }
 0x7e2   : > { %3735 = vmatprep.subr.bf16.mxu0 %v5594_v13  ;;  %3778 = vmatprep.subr.bf16.mxu1 %v5596_v58  ;;  %v6155_v13 = vld [vmem:[%s6473_s0 + $0x1c0] sm:$0xff]   ;;  %v3346_v58 = vsub.s32 6, %v6546_v31 }
 0x7e4   : > { %5619 = vmatmul.mubr.msk.bf16.vlgmr.msra.gmra.mrb[24].mxu0 %vm638_vm2, %v6910_v22  ;;  %5620 = vmatmul.mubr.msk.bf16.vlgmr.msra.gmra.mrb[28].mxu1 %vm638_vm2, %v6910_v22  ;;  %v6989_v21 = vrot.slane %v6986_v2, %v3346_v58 }
 0x7e5   : > { %3736 = vmatpush1.bf16.msra.mxu0 %v5593_v32  ;;  %3779 = vmatpush1.bf16.msra.mxu1 %v5595_v33  ;;  %v3315_v32 = vld [vmem:[%s6463_s3] sm:$0xff]  ;;  %v3326_v33 = vsub.s32 1, %v6546_v31 }
 0x7e6   : > { %3737 = vmatprep.subr.bf16.mxu0 %v5610_v20  ;;  %3780 = vmatprep.subr.bf16.mxu1 %v5612_v34  ;;  %v3334_v20 = vsub.s32 3, %v6546_v31  ;;  %v3323_v34 = vrot.slane %v3315_v32, %v3322_v19  ;;  %v3331_v26 = vrot.slane %v3315_v32, %v3330_v30 }
 0x7e7   : > { %3767 = vmatprep.mubr.bf16.mxu0 %v6342_v55  ;;  %3810 = vmatprep.mubr.bf16.mxu1 %v6342_v55  ;;  %v3327_v36 = vrot.slane %v3315_v32, %v3326_v33 }
 0x7e8   : > { %v3335_v37 = vrot.slane %v3315_v32, %v3334_v20 }
 0x7e9   : > { %3738 = vmatpush1.bf16.msra.mxu0 %v5609_v39  ;;  %3781 = vmatpush1.bf16.msra.mxu1 %v5611_v40 }
 0x7ea   : > { %3821 = vmatprep.subr.bf16.mxu0 %v5598_v41  ;;  %3864 = vmatprep.subr.bf16.mxu1 %v5600_v23  ;;  %v3342_v41 = vsub.s32 5, %v6546_v31  ;;  %v3350_v23 = vsub.s32 7, %v6546_v31 }
 0x7ec   : > { %5621 = vmatmul.mubr.msk.bf16.vlgmr.msra.gmra.mrb[28].mxu0 %vm638_vm2, %v6910_v22  ;;  %5622 = vmatmul.mubr.msk.bf16.vlgmr.msra.gmra.mrb[32].mxu1 %vm638_vm2, %v6910_v22 }
 0x7ed   : > { %3822 = vmatpush1.bf16.msra.mxu0 %v5597_v51  ;;  %3865 = vmatpush1.bf16.msra.mxu1 %v5599_v52 }
 0x7ee   : > { %3823 = vmatprep.subr.bf16.mxu0 %v5614_v47  ;;  %3866 = vmatprep.subr.bf16.mxu1 %v5616_v57 }
 0x7ef   : > { %3853 = vmatprep.mubr.bf16.mxu0 %v6342_v55  ;;  %3896 = vmatprep.mubr.bf16.mxu1 %v6342_v55  ;;  %v6128_v55 = vld [vmem:[%s6473_s0 + $0x8] sm:$0xff]  }
 0x7f1   : > { %3824 = vmatpush1.bf16.msra.mxu0 %v5613_v59  ;;  %3867 = vmatpush1.bf16.msra.mxu1 %v5615_v60 }
 0x7f2   : > { %5802 = vmatprep.subr.bf16.mxu0 %v6122_v35  ;;  %5824 = vmatprep.subr.bf16.mxu1 %v6123_v61 }
 0x7f4   : > { %5623 = vmatmul.mubr.msk.bf16.vlgmr.msra.gmra.mrb[32].mxu0 %vm638_vm2, %v6910_v22  ;;  %5624 = vmatmul.mubr.msk.bf16.vlgmr.msra.gmra.mrb[36].mxu1 %vm638_vm2, %v6910_v22  ;;  %v6146_v22 = vld [vmem:[%s6473_s0 + $0x70] sm:$0xff]  }
 0x7f5   : > { %5803 = vmatpush3.bf16.msra.mxu0 %v6124_v43  ;;  %5825 = vmatpush3.bf16.msra.mxu1 %v6125_v18  ;;  %v3339_v43 = vrot.slane %v3315_v32, %v3338_v38  ;;  %v3347_v18 = vrot.slane %v3315_v32, %v3346_v58 }
 0x7f6   : > { %5804 = vmatprep.subr.bf16.mxu0 %v6126_v3  ;;  %5826 = vmatprep.subr.bf16.mxu1 %v6127_v44 }
 0x7f9   : > { %5805 = vmatpush3.bf16.msra.mxu0 %v6128_v55  ;;  %5827 = vmatpush3.bf16.msra.mxu1 %v6129_v53  ;;  %v3343_v55 = vrot.slane %v3315_v32, %v3342_v41  ;;  %v3351_v53 = vrot.slane %v3315_v32, %v3350_v23  ;;  %v3363_v32 = vrot.slane %v6986_v2, %v3330_v30 }
 0x7fa   : > { %5806 = vmatprep.subr.bf16.mxu0 %v6130_v42  ;;  %5828 = vmatprep.subr.bf16.mxu1 %v6131_v17  ;;  %v3367_v30 = vrot.slane %v6986_v2, %v3334_v20 }
 0x7fd   : > { %5807 = vmatpush3.bf16.msra.mxu0 %v6132_v54  ;;  %5829 = vmatpush3.bf16.msra.mxu1 %v6133_v16 }
 0x7fe   : > { %5808 = vmatprep.subr.bf16.mxu0 %v6134_v62  ;;  %5830 = vmatprep.subr.bf16.mxu1 %v6135_v1 }
 0x801   : > { %5809 = vmatpush3.bf16.msra.mxu0 %v6136_v5  ;;  %5831 = vmatpush3.bf16.msra.mxu1 %v6137_v6 }
 0x802   : > { %5810 = vmatprep.subr.bf16.mxu0 %v6138_v14  ;;  %5832 = vmatprep.subr.bf16.mxu1 %v6139_v7 }
 0x805   : > { %5811 = vmatpush3.bf16.msra.mxu0 %v6140_v8  ;;  %5833 = vmatpush3.bf16.msra.mxu1 %v6141_v9 }
 0x806   : > { %5812 = vmatprep.subr.bf16.mxu0 %v6142_v10  ;;  %5834 = vmatprep.subr.bf16.mxu1 %v6143_v63 }
 0x809   : > { %5813 = vmatpush3.bf16.msra.mxu0 %v6144_v0  ;;  %5835 = vmatpush3.bf16.msra.mxu1 %v6145_v4  ;;  %v6156_v0 = vld [vmem:[%s6473_s0 + $0x100] sm:$0xff]  }
 0x80a   : > { %5814 = vmatprep.subr.bf16.mxu0 %v6146_v22  ;;  %5836 = vmatprep.subr.bf16.mxu1 %v6147_v46  ;;  %v6157_v4 = vld [vmem:[%s6473_s0 + $0x180] sm:$0xff]  }
 0x80d   : > { %5815 = vmatpush3.bf16.msra.mxu0 %v6148_v24  ;;  %5837 = vmatpush3.bf16.msra.mxu1 %v6149_v56 }
 0x80e   : > { %5816 = vmatprep.subr.bf16.mxu0 %v6150_v25  ;;  %5838 = vmatprep.subr.bf16.mxu1 %v6151_v27  ;;  %v6158_v25 = vld [vmem:[%s6473_s0 + $0x148] sm:$0xff]  }
 0x80f   : > { %v6159_v27 = vld [vmem:[%s6473_s0 + $0x1c8] sm:$0xff]  }
 0x811   : > { %5817 = vmatpush3.bf16.msra.mxu0 %v6152_v28  ;;  %5839 = vmatpush3.bf16.msra.mxu1 %v6153_v12  ;;  %v3355_v28 = vrot.slane %v6986_v2, %v3322_v19  ;;  %v3359_v19 = vrot.slane %v6986_v2, %v3326_v33  ;;  %v6163_v33 = vld [vmem:[%s6473_s0 + $0x1d0] sm:$0xff]  }
 0x812   : > { %5846 = vmatprep.subr.bf16.mxu0 %v6154_v29  ;;  %5868 = vmatprep.subr.bf16.mxu1 %v6155_v13 }
 0x8af   : > { %v3597_v39 = vpop.f32.mrb[20].mxu0  ;;  %v3640_v40 = vpop.f32.mrb[24].mxu1 }
 0x8b0   : > { %v3598_v45 = vadd.f32 %v3597_v39, %v3323_v34  ;;  %v3641_v48 = vadd.f32 %v3640_v40, %v3331_v26  ;;  %v3599_v49 = vpop.f32.mrb[21].mxu0  ;;  %v3642_v50 = vpop.f32.mrb[25].mxu1 }
 0x8b1   : > { %v3600_v51 = vadd.f32 %v3599_v49, %v3327_v36  ;;  %v3643_v52 = vadd.f32 %v3642_v50, %v3335_v37  ;;  %v3601_v47 = vpop.f32.mrb[22].mxu0  ;;  %v3644_v57 = vpop.f32.mrb[26].mxu1 }
 0x8b2   : > { %v3602_v59 = vadd.f32 %v3601_v47, %v3323_v34  ;;  %v3645_v60 = vadd.f32 %v3644_v57, %v3331_v26  ;;  %v3603_v35 = vpop.f32.mrb[23].mxu0  ;;  %v3646_v61 = vpop.f32.mrb[27].mxu1  ;;  %v3907_v42 = vmax.f32 %v3598_v45, 0.0  ;;  %v3909_v17 = vmax.f32 %v3641_v48, 0.0  ;;  %v6160_v45 = vld [vmem:[%s6473_s0 + $0x108] sm:$0xff]   ;;  %v6162_v47 = vld [vmem:[%s6473_s0 + $0x150] sm:$0xff]  }
 0x8b3   : > { %v3604_v3 = vadd.f32 %v3603_v35, %v3327_v36  ;;  %v3647_v44 = vadd.f32 %v3646_v61, %v3335_v37  ;;  %v3908_v62 = vmax.f32 %v3600_v51, 0.0  ;;  %v3910_v1 = vmax.f32 %v3643_v52, 0.0  ;;  %v6161_v48 = vld [vmem:[%s6473_s0 + $0x188] sm:$0xff]  }
 0x8b4   : > { %v3923_v54 = vmax.f32 %v3602_v59, 0.0  ;;  %v3925_v16 = vmax.f32 %v3645_v60, 0.0 }
 0x8b5   : > { %v3924_v5 = vmax.f32 %v3604_v3, 0.0  ;;  %v3926_v6 = vmax.f32 %v3647_v44, 0.0 }
 0x8b6   : > { %v4196_v14 = vpack.c.bf16 %v3923_v54, %v3907_v42  ;;  %v4198_v7 = vpack.c.bf16 %v3925_v16, %v3909_v17 }
 0x8b7   : > { %v4197_v8 = vpack.c.bf16 %v3924_v5, %v3908_v62  ;;  %v4199_v9 = vpack.c.bf16 %v3926_v6, %v3910_v1  ;;  %v3683_v10 = vpop.f32.mrb[24].mxu0  ;;  %v3726_v63 = vpop.f32.mrb[28].mxu1  ;;  %v6166_v62 = vld [vmem:[%s6473_s0 + $0x158] sm:$0xff]  }
 0x8b8   : > { %v3684_v22 = vadd.f32 %v3683_v10, %v3339_v43  ;;  %v3727_v46 = vadd.f32 %v3726_v63, %v3347_v18  ;;  %v3685_v24 = vpop.f32.mrb[25].mxu0  ;;  %v3728_v56 = vpop.f32.mrb[29].mxu1  ;;  %v6167_v1 = vld [vmem:[%s6473_s0 + $0x1d8] sm:$0xff]  }
 0x8b9   : > { %v3686_v12 = vadd.f32 %v3685_v24, %v3343_v55  ;;  %v3729_v29 = vadd.f32 %v3728_v56, %v3351_v53  ;;  %v3687_v13 = vpop.f32.mrb[26].mxu0  ;;  %v3730_v58 = vpop.f32.mrb[30].mxu1  ;;  %5018 = vmatprep.mubr.bf16.mxu0 %v4197_v8  ;;  %5059 = vmatprep.mubr.bf16.mxu1 %v4199_v9  ;;  %v6168_v24 = vld [vmem:[%s6473_s0 + $0x118] sm:$0xff]  }
 0x8ba   : > { %v3688_v34 = vadd.f32 %v3687_v13, %v3339_v43  ;;  %v3731_v26 = vadd.f32 %v3730_v58, %v3347_v18  ;;  %v3689_v36 = vpop.f32.mrb[27].mxu0  ;;  %v3732_v37 = vpop.f32.mrb[31].mxu1  ;;  %5019 = vmatmul.mubr.bf16.vlgmr.msra.gmra.mrb[36].mxu0 %v4196_v14  ;;  %5060 = vmatmul.mubr.bf16.vlgmr.msra.gmra.mrb[40].mxu1 %v4198_v7  ;;  %v3911_v49 = vmax.f32 %v3684_v22, 0.0  ;;  %v3913_v50 = vmax.f32 %v3727_v46, 0.0  ;;  %v6169_v56 = vld [vmem:[%s6473_s0 + $0x198] sm:$0xff]  }
 0x8bb   : > { %v3690_v39 = vadd.f32 %v3689_v36, %v3343_v55  ;;  %v3733_v40 = vadd.f32 %v3732_v37, %v3351_v53  ;;  %5847 = vmatpush3.bf16.msra.mxu0 %v6156_v0  ;;  %5869 = vmatpush3.bf16.msra.mxu1 %v6157_v4  ;;  %v3912_v57 = vmax.f32 %v3686_v12, 0.0  ;;  %v3914_v59 = vmax.f32 %v3729_v29, 0.0  ;;  %v6164_v55 = vld [vmem:[%s6473_s0 + $0x110] sm:$0xff]  }
 0x8bc   : > { %v3927_v51 = vmax.f32 %v3688_v34, 0.0  ;;  %v3929_v52 = vmax.f32 %v3731_v26, 0.0  ;;  %5848 = vmatprep.subr.bf16.mxu0 %v6158_v25  ;;  %5870 = vmatprep.subr.bf16.mxu1 %v6159_v27  ;;  %v6165_v53 = vld [vmem:[%s6473_s0 + $0x190] sm:$0xff]   ;;  %v3371_v0 = vrot.slane %v6986_v2, %v3338_v38  ;;  %v3375_v4 = vrot.slane %v6986_v2, %v3342_v41  ;;  %v6170_v38 = vld [vmem:[%s6473_s0 + $0x160] sm:$0xff]  }
 0x8bd   : > { %v3928_v60 = vmax.f32 %v3690_v39, 0.0  ;;  %v3930_v35 = vmax.f32 %v3733_v40, 0.0  ;;  %v3383_v25 = vrot.slane %v6986_v2, %v3350_v23  ;;  %v6171_v41 = vld [vmem:[%s6473_s0 + $0x1e0] sm:$0xff]  }
 0x8be   : > { %v7025_v61 = vpack.c.bf16 %v3927_v51, %v3911_v49  ;;  %v7027_v43 = vpack.c.bf16 %v3929_v52, %v3913_v50  ;;  %v6173_v39 = vld [vmem:[%s6473_s0 + $0x1a0] sm:$0xff]   ;;  %v6174_v49 = vld [vmem:[%s6473_s0 + $0x168] sm:$0xff]  }
 0x8bf   : > { %v4201_v20 = vpack.c.bf16 %v3928_v60, %v3912_v57  ;;  %v4203_v18 = vpack.c.bf16 %v3930_v35, %v3914_v59  ;;  %5849 = vmatpush3.bf16.msra.mxu0 %v6160_v45  ;;  %5871 = vmatpush3.bf16.msra.mxu1 %v6161_v48  ;;  %v3769_v3 = vpop.f32.mrb[28].mxu0  ;;  %v3812_v44 = vpop.f32.mrb[32].mxu1  ;;  %v6175_v50 = vld [vmem:[%s6473_s0 + $0x1e8] sm:$0xff]  }
 0x8c0   : > { %v3770_v42 = vadd.f32 %v3769_v3, %v3355_v28  ;;  %v3813_v17 = vadd.f32 %v3812_v44, %v3363_v32  ;;  %v3771_v54 = vpop.f32.mrb[29].mxu0  ;;  %v3814_v16 = vpop.f32.mrb[33].mxu1  ;;  %5850 = vmatprep.subr.bf16.mxu0 %v6162_v47  ;;  %5872 = vmatprep.subr.bf16.mxu1 %v6163_v33  ;;  %v6176_v3 = vld [vmem:[%s6473_s0 + $0x128] sm:$0xff]  }
 0x8c1   : > { %v3772_v5 = vadd.f32 %v3771_v54, %v3359_v19  ;;  %v3815_v6 = vadd.f32 %v3814_v16, %v3367_v30  ;;  %v3773_v14 = vpop.f32.mrb[30].mxu0  ;;  %v3816_v7 = vpop.f32.mrb[34].mxu1  ;;  %5100 = vmatprep.mubr.bf16.mxu0 %v4201_v20  ;;  %5141 = vmatprep.mubr.bf16.mxu1 %v4203_v18  ;;  %v6177_v44 = vld [vmem:[%s6473_s0 + $0x1a8] sm:$0xff]   ;;  %v6178_v54 = vld [vmem:[%s6473_s0 + $0x170] sm:$0xff]  }
 0x8c2   : > { %v3774_v8 = vadd.f32 %v3773_v14, %v3355_v28  ;;  %v3817_v9 = vadd.f32 %v3816_v7, %v3363_v32  ;;  %v3775_v10 = vpop.f32.mrb[31].mxu0  ;;  %v3818_v63 = vpop.f32.mrb[35].mxu1  ;;  %v3915_v27 = vmax.f32 %v3770_v42, 0.0  ;;  %v3917_v28 = vmax.f32 %v3813_v17, 0.0 }
 0x8c3   : > { %v3776_v22 = vadd.f32 %v3775_v10, %v3359_v19  ;;  %v3819_v46 = vadd.f32 %v3818_v63, %v3367_v30  ;;  %5851 = vmatpush3.bf16.msra.mxu0 %v6164_v55  ;;  %5873 = vmatpush3.bf16.msra.mxu1 %v6165_v53  ;;  %v3916_v13 = vmax.f32 %v3772_v5, 0.0  ;;  %v3918_v58 = vmax.f32 %v3815_v6, 0.0  ;;  %v6172_v19 = vld [vmem:[%s6473_s0 + $0x120] sm:$0xff]   ;;  %v6181_v10 = vld [vmem:[%s6473_s0 + $0x1b0] sm:$0xff]   ;;  %v6182_v63 = vld [vmem:[%s6473_s0 + $0x178] sm:$0xff]  }
 0x8c4   : > { %v3931_v12 = vmax.f32 %v3774_v8, 0.0  ;;  %v3933_v29 = vmax.f32 %v3817_v9, 0.0  ;;  %5852 = vmatprep.subr.bf16.mxu0 %v6166_v62  ;;  %5874 = vmatprep.subr.bf16.mxu1 %v6167_v1  ;;  %v6180_v9 = vld [vmem:[%s6473_s0 + $0x130] sm:$0xff]  }
 0x8c5   : > { %v3932_v32 = vmax.f32 %v3776_v22, 0.0  ;;  %v3934_v34 = vmax.f32 %v3819_v46, 0.0  ;;  %v6185_v22 = vld [vmem:[%s6473_s0 + $0x1b8] sm:$0xff]   ;;  %v6186_v46 = vld [vmem:[%s6473_s0 + $0x240] sm:$0xff]  }
 0x8c6   : > { %v7046_v26 = vpack.c.bf16 %v3931_v12, %v3915_v27  ;;  %v7048_v31 = vpack.c.bf16 %v3933_v29, %v3917_v28  ;;  %v6190_v27 = vld [vmem:[%s6473_s0 + $0x248] sm:$0xff]  }
 0x8c7   : > { %v7050_v2 = vpack.c.bf16 %v3932_v32, %v3916_v13  ;;  %v7052_v23 = vpack.c.bf16 %v3934_v34, %v3918_v58  ;;  %5853 = vmatpush3.bf16.msra.mxu0 %v6168_v24  ;;  %5875 = vmatpush3.bf16.msra.mxu1 %v6169_v56  ;;  %v3855_v36 = vpop.f32.mrb[32].mxu0  ;;  %v3898_v37 = vpop.f32.mrb[36].mxu1  ;;  %v6187_v24 = vld [vmem:[%s6473_s0 + $0x2c0] sm:$0xff]   ;;  %v6191_v28 = vld [vmem:[%s6473_s0 + $0x2c8] sm:$0xff]   ;;  %v6198_v13 = vld [vmem:[%s6473_s0 + $0x258] sm:$0xff]  }
 0x8c8   : > { %v3856_v40 = vadd.f32 %v3855_v36, %v3371_v0  ;;  %v3899_v45 = vadd.f32 %v3898_v37, %v6989_v21  ;;  %v3857_v48 = vpop.f32.mrb[33].mxu0  ;;  %v3900_v30 = vpop.f32.mrb[37].mxu1  ;;  %5854 = vmatprep.subr.bf16.mxu0 %v6170_v38  ;;  %5876 = vmatprep.subr.bf16.mxu1 %v6171_v41  ;;  %v6188_v56 = vld [vmem:[%s6473_s0 + $0x200] sm:$0xff]   ;;  %v6192_v12 = vld [vmem:[%s6473_s0 + $0x208] sm:$0xff]   ;;  %v6194_v38 = vld [vmem:[%s6473_s0 + $0x250] sm:$0xff]  }
 0x8c9   : > { %v3858_v51 = vadd.f32 %v3857_v48, %v3375_v4  ;;  %v3901_v52 = vadd.f32 %v3900_v30, %v3383_v25  ;;  %v3859_v47 = vpop.f32.mrb[34].mxu0  ;;  %v3902_v33 = vpop.f32.mrb[38].mxu1  ;;  %v6193_v29 = vld [vmem:[%s6473_s0 + $0x288] sm:$0xff]   ;;  %v6197_v41 = vld [vmem:[%s6473_s0 + $0x290] sm:$0xff]   ;;  %v6199_v58 = vld [vmem:[%s6473_s0 + $0x2d8] sm:$0xff]  }
 0x8ca   : > { %v3860_v57 = vadd.f32 %v3859_v47, %v3371_v0  ;;  %v3903_v59 = vadd.f32 %v3902_v33, %v6989_v21  ;;  %v3861_v60 = vpop.f32.mrb[35].mxu0  ;;  %v3904_v35 = vpop.f32.mrb[39].mxu1  ;;  %v3919_v55 = vmax.f32 %v3856_v40, 0.0  ;;  %v3921_v53 = vmax.f32 %v3899_v45, 0.0  ;;  %v6179_v21 = vld [vmem:[%s6473_s0 + $0x1f0] sm:$0xff]   ;;  %v6183_v0 = vld [vmem:[%s6473_s0 + $0x1f8] sm:$0xff]  }
 0x8cb   : > { %v3862_v20 = vadd.f32 %v3861_v60, %v3375_v4  ;;  %v3905_v18 = vadd.f32 %v3904_v35, %v3383_v25  ;;  %5855 = vmatpush3.bf16.msra.mxu0 %v6172_v19  ;;  %5877 = vmatpush3.bf16.msra.mxu1 %v6173_v39  ;;  %v3920_v16 = vmax.f32 %v3858_v51, 0.0  ;;  %v3922_v62 = vmax.f32 %v3901_v52, 0.0  ;;  %v6184_v4 = vld [vmem:[%s6473_s0 + $0x138] sm:$0xff]   ;;  %v6189_v25 = vld [vmem:[%s6473_s0 + $0x280] sm:$0xff]   ;;  %v6206_v19 = vld [vmem:[%s6473_s0 + $0x268] sm:$0xff]  }
 0x8cc   : > { %v3935_v42 = vmax.f32 %v3860_v57, 0.0  ;;  %v3937_v17 = vmax.f32 %v3903_v59, 0.0  ;;  %5856 = vmatprep.subr.bf16.mxu0 %v6174_v49  ;;  %5878 = vmatprep.subr.bf16.mxu1 %v6175_v50  ;;  %v6200_v32 = vld [vmem:[%s6473_s0 + $0x218] sm:$0xff]   ;;  %v6204_v36 = vld [vmem:[%s6473_s0 + $0x220] sm:$0xff]   ;;  %v6207_v39 = vld [vmem:[%s6473_s0 + $0x2e8] sm:$0xff]  }
 0x8cd   : > { %v3936_v1 = vmax.f32 %v3862_v20, 0.0  ;;  %v3938_v5 = vmax.f32 %v3905_v18, 0.0  ;;  %v6201_v34 = vld [vmem:[%s6473_s0 + $0x298] sm:$0xff]   ;;  %v6205_v37 = vld [vmem:[%s6473_s0 + $0x2a0] sm:$0xff]   ;;  %v6208_v40 = vld [vmem:[%s6473_s0 + $0x228] sm:$0xff]  }
 0x8ce   : > { %v7064_v6 = vpack.c.bf16 %v3935_v42, %v3919_v55  ;;  %v7066_v14 = vpack.c.bf16 %v3937_v17, %v3921_v53  ;;  %v6209_v45 = vld [vmem:[%s6473_s0 + $0x2a8] sm:$0xff]   ;;  %v6210_v48 = vld [vmem:[%s6473_s0 + $0x270] sm:$0xff]   ;;  %v6214_v51 = vld [vmem:[%s6473_s0 + $0x278] sm:$0xff]  }
 0x8cf   : > { %v7068_v7 = vpack.c.bf16 %v3936_v1, %v3920_v16  ;;  %v7070_v8 = vpack.c.bf16 %v3938_v5, %v3922_v62  ;;  %5857 = vmatpush3.bf16.msra.mxu0 %v6176_v3  ;;  %5879 = vmatpush3.bf16.msra.mxu1 %v6177_v44  ;;  %v6211_v30 = vld [vmem:[%s6473_s0 + $0x2f0] sm:$0xff]   ;;  %v6215_v52 = vld [vmem:[%s6473_s0 + $0x2f8] sm:$0xff]   ;;  %v6218_v57 = vld [vmem:[%s6473_s0 + $0x340] sm:$0xff]  }
 0x8d0   : > { %5858 = vmatprep.subr.bf16.mxu0 %v6178_v54  ;;  %5880 = vmatprep.subr.bf16.mxu1 %v6179_v21  ;;  %v6212_v49 = vld [vmem:[%s6473_s0 + $0x230] sm:$0xff]   ;;  %v6216_v47 = vld [vmem:[%s6473_s0 + $0x238] sm:$0xff]   ;;  %v6219_v59 = vld [vmem:[%s6473_s0 + $0x3c0] sm:$0xff]  }
 0x8d1   : > { %v6213_v50 = vld [vmem:[%s6473_s0 + $0x2b0] sm:$0xff]   ;;  %v6217_v33 = vld [vmem:[%s6473_s0 + $0x2b8] sm:$0xff]   ;;  %v6220_v60 = vld [vmem:[%s6473_s0 + $0x300] sm:$0xff]  }
 0x8d2   : > { %v6221_v35 = vld [vmem:[%s6473_s0 + $0x380] sm:$0xff]   ;;  %v6222_v20 = vld [vmem:[%s6473_s0 + $0x348] sm:$0xff]   ;;  %v6226_v55 = vld [vmem:[%s6473_s0 + $0x350] sm:$0xff]  }
 0x8d3   : > { %5859 = vmatpush3.bf16.msra.mxu0 %v6180_v9  ;;  %5881 = vmatpush3.bf16.msra.mxu1 %v6181_v10  ;;  %v6223_v18 = vld [vmem:[%s6473_s0 + $0x3c8] sm:$0xff]   ;;  %v6229_v53 = vld [vmem:[%s6473_s0 + $0x390] sm:$0xff]   ;;  %v6230_v42 = vld [vmem:[%s6473_s0 + $0x358] sm:$0xff]  }
 0x8d4   : > { %5860 = vmatprep.subr.bf16.mxu0 %v6182_v63  ;;  %5882 = vmatprep.subr.bf16.mxu1 %v6183_v0  ;;  %v6224_v3 = vld [vmem:[%s6473_s0 + $0x308] sm:$0xff]   ;;  %v6231_v17 = vld [vmem:[%s6473_s0 + $0x3d8] sm:$0xff]   ;;  %v6234_v16 = vld [vmem:[%s6473_s0 + $0x360] sm:$0xff]  }
 0x8d5   : > { %v6225_v44 = vld [vmem:[%s6473_s0 + $0x388] sm:$0xff]   ;;  %v6232_v54 = vld [vmem:[%s6473_s0 + $0x318] sm:$0xff]   ;;  %v6235_v62 = vld [vmem:[%s6473_s0 + $0x3e0] sm:$0xff]  }
 0x8d6   : > { %v6233_v21 = vld [vmem:[%s6473_s0 + $0x398] sm:$0xff]   ;;  %v6236_v1 = vld [vmem:[%s6473_s0 + $0x320] sm:$0xff]   ;;  %v6240_v9 = vld [vmem:[%s6473_s0 + $0x328] sm:$0xff]  }
 0x8d7   : > { %5861 = vmatpush3.bf16.msra.mxu0 %v6184_v4  ;;  %5883 = vmatpush3.bf16.msra.mxu1 %v6185_v22  ;;  %v6237_v5 = vld [vmem:[%s6473_s0 + $0x3a0] sm:$0xff]   ;;  %v6241_v10 = vld [vmem:[%s6473_s0 + $0x3a8] sm:$0xff]   ;;  %v6242_v63 = vld [vmem:[%s6473_s0 + $0x370] sm:$0xff]  }
 0x8d8   : > { %5890 = vmatprep.subr.bf16.mxu0 %v6186_v46  ;;  %5912 = vmatprep.subr.bf16.mxu1 %v6187_v24  ;;  %v6243_v0 = vld [vmem:[%s6473_s0 + $0x3f0] sm:$0xff]   ;;  %v6246_v46 = vld [vmem:[%s6473_s0 + $0x378] sm:$0xff]  }
 0x8d9   : > { %v6244_v4 = vld [vmem:[%s6473_s0 + $0x330] sm:$0xff]   ;;  %v6247_v24 = vld [vmem:[%s6473_s0 + $0x3f8] sm:$0xff]  }
 0x8da   : > { %5101 = vmatmul.mubr.bf16.vlgmr.msra.gmra.mrb[40].mxu0 %v7025_v61  ;;  %5142 = vmatmul.mubr.bf16.vlgmr.msra.gmra.mrb[44].mxu1 %v7027_v43  ;;  %v6195_v61 = vld [vmem:[%s6473_s0 + $0x2d0] sm:$0xff]  }
 0x8db   : > { %5891 = vmatpush3.bf16.msra.mxu0 %v6188_v56  ;;  %5182 = vmatprep.mubr.bf16.mxu0 %v7050_v2  ;;  %v6196_v43 = vld [vmem:[%s6473_s0 + $0x210] sm:$0xff]   ;;  %v6202_v2 = vld [vmem:[%s6473_s0 + $0x260] sm:$0xff]   ;;  %v6248_v56 = vld [vmem:[%s6473_s0 + $0x338] sm:$0xff]  }
 0x8dc   : > { %5913 = vmatpush3.bf16.msra.mxu1 %v6189_v25  ;;  %5223 = vmatprep.mubr.bf16.mxu1 %v7052_v23  ;;  %v6203_v23 = vld [vmem:[%s6473_s0 + $0x2e0] sm:$0xff]   ;;  %v6245_v22 = vld [vmem:[%s6473_s0 + $0x3b0] sm:$0xff]   ;;  %v6249_v25 = vld [vmem:[%s6473_s0 + $0x3b8] sm:$0xff]  }
 0x8dd   : > { %5892 = vmatprep.subr.bf16.mxu0 %v6190_v27  ;;  %5914 = vmatprep.subr.bf16.mxu1 %v6191_v28 }
 0x8df   : > { %5893 = vmatpush3.bf16.msra.mxu0 %v6192_v12  ;;  %v5625_v12 = vld [vmem:[%s595_s25] ss:$0 sm:$0xff] }
 0x8e0   : > { %5915 = vmatpush3.bf16.msra.mxu1 %v6193_v29  ;;  %5894 = vmatprep.subr.bf16.mxu0 %v6194_v38 }
 0x8e1   : > { %5916 = vmatprep.subr.bf16.mxu1 %v6195_v61 }
 0x8e3   : > { %5895 = vmatpush3.bf16.msra.mxu0 %v6196_v43 }
 0x8e4   : > { %5917 = vmatpush3.bf16.msra.mxu1 %v6197_v41  ;;  %5896 = vmatprep.subr.bf16.mxu0 %v6198_v13 }
 0x8e5   : > { %5918 = vmatprep.subr.bf16.mxu1 %v6199_v58 }
 0x8e7   : > { %5897 = vmatpush3.bf16.msra.mxu0 %v6200_v32 }
 0x8e8   : > { %5919 = vmatpush3.bf16.msra.mxu1 %v6201_v34  ;;  %5898 = vmatprep.subr.bf16.mxu0 %v6202_v2 }
 0x8e9   : > { %5920 = vmatprep.subr.bf16.mxu1 %v6203_v23 }
 0x8eb   : > { %5899 = vmatpush3.bf16.msra.mxu0 %v6204_v36 }
 0x8ec   : > { %5921 = vmatpush3.bf16.msra.mxu1 %v6205_v37  ;;  %5900 = vmatprep.subr.bf16.mxu0 %v6206_v19 }
 0x8ed   : > { %5922 = vmatprep.subr.bf16.mxu1 %v6207_v39 }
 0x8ef   : > { %5901 = vmatpush3.bf16.msra.mxu0 %v6208_v40 }
 0x8f0   : > { %5923 = vmatpush3.bf16.msra.mxu1 %v6209_v45  ;;  %5902 = vmatprep.subr.bf16.mxu0 %v6210_v48 }
 0x8f1   : > { %5924 = vmatprep.subr.bf16.mxu1 %v6211_v30 }
 0x8f3   : > { %5903 = vmatpush3.bf16.msra.mxu0 %v6212_v49 }
 0x8f4   : > { %5925 = vmatpush3.bf16.msra.mxu1 %v6213_v50  ;;  %5904 = vmatprep.subr.bf16.mxu0 %v6214_v51 }
 0x8f5   : > { %5926 = vmatprep.subr.bf16.mxu1 %v6215_v52 }
 0x8f7   : > { %5905 = vmatpush3.bf16.msra.mxu0 %v6216_v47 }
 0x8f8   : > { %5927 = vmatpush3.bf16.msra.mxu1 %v6217_v33  ;;  %5934 = vmatprep.subr.bf16.mxu0 %v6218_v57 }
 0x8f9   : > { %5956 = vmatprep.subr.bf16.mxu1 %v6219_v59 }
 0x8fa   : > { %5183 = vmatmul.mubr.bf16.vlgmr.msra.gmra.mrb[44].mxu0 %v7046_v26  ;;  %v6227_v26 = vld [vmem:[%s6473_s0 + $0x3d0] sm:$0xff]  }
 0x8fb   : > { %5224 = vmatmul.mubr.bf16.vlgmr.msra.gmra.mrb[48].mxu1 %v7048_v31  ;;  %5935 = vmatpush3.bf16.msra.mxu0 %v6220_v60  ;;  %v6228_v31 = vld [vmem:[%s6473_s0 + $0x310] sm:$0xff]  }
 0x8fc   : > { %5264 = vmatprep.mubr.bf16.mxu0 %v7068_v7  ;;  %5957 = vmatpush3.bf16.msra.mxu1 %v6221_v35  ;;  %v6238_v7 = vld [vmem:[%s6473_s0 + $0x368] sm:$0xff]  }
 0x8fd   : > { %5305 = vmatprep.mubr.bf16.mxu1 %v7070_v8  ;;  %5936 = vmatprep.subr.bf16.mxu0 %v6222_v20  ;;  %v6239_v8 = vld [vmem:[%s6473_s0 + $0x3e8] sm:$0xff]  }
 0x8fe   : > { %5958 = vmatprep.subr.bf16.mxu1 %v6223_v18 }
 0x8ff   : > { %5937 = vmatpush3.bf16.msra.mxu0 %v6224_v3 }
 0x900   : > { %5959 = vmatpush3.bf16.msra.mxu1 %v6225_v44  ;;  %5938 = vmatprep.subr.bf16.mxu0 %v6226_v55 }
 0x901   : > { %5960 = vmatprep.subr.bf16.mxu1 %v6227_v26 }
 0x903   : > { %5939 = vmatpush3.bf16.msra.mxu0 %v6228_v31 }
 0x904   : > { %5961 = vmatpush3.bf16.msra.mxu1 %v6229_v53  ;;  %5940 = vmatprep.subr.bf16.mxu0 %v6230_v42 }
 0x905   : > { %5962 = vmatprep.subr.bf16.mxu1 %v6231_v17 }
 0x907   : > { %5941 = vmatpush3.bf16.msra.mxu0 %v6232_v54 }
 0x908   : > { %5963 = vmatpush3.bf16.msra.mxu1 %v6233_v21  ;;  %5942 = vmatprep.subr.bf16.mxu0 %v6234_v16 }
 0x909   : > { %5964 = vmatprep.subr.bf16.mxu1 %v6235_v62 }
 0x90b   : > { %5943 = vmatpush3.bf16.msra.mxu0 %v6236_v1 }
 0x90c   : > { %5965 = vmatpush3.bf16.msra.mxu1 %v6237_v5  ;;  %5944 = vmatprep.subr.bf16.mxu0 %v6238_v7 }
 0x90d   : > { %5966 = vmatprep.subr.bf16.mxu1 %v6239_v8 }
 0x90f   : > { %5945 = vmatpush3.bf16.msra.mxu0 %v6240_v9 }
 0x910   : > { %5967 = vmatpush3.bf16.msra.mxu1 %v6241_v10  ;;  %5946 = vmatprep.subr.bf16.mxu0 %v6242_v63 }
 0x911   : > { %5968 = vmatprep.subr.bf16.mxu1 %v6243_v0 }
 0x913   : > { %5947 = vmatpush3.bf16.msra.mxu0 %v6244_v4 }
 0x914   : > { %5969 = vmatpush3.bf16.msra.mxu1 %v6245_v22  ;;  %5948 = vmatprep.subr.bf16.mxu0 %v6246_v46 }
 0x915   : > { %5970 = vmatprep.subr.bf16.mxu1 %v6247_v24 }
 0x917   : > { %5949 = vmatpush3.bf16.msra.mxu0 %v6248_v56 }
 0x918   : > { %5971 = vmatpush3.bf16.msra.mxu1 %v6249_v25 }
 0x91a   : > { %5265 = vmatmul.mubr.bf16.vlgmr.msra.gmra.mrb[48].mxu0 %v7064_v6 }
 0x91b   : > { %5306 = vmatmul.mubr.bf16.vlgmr.msra.gmra.mrb[52].mxu1 %v7066_v14 }
 0x98d   : > { %v5818_v27 = vpop.f32.mrb[36].mxu0  ;;  %v5840_v28 = vpop.f32.mrb[40].mxu1 }
 0x98e   : > { %v5819_v29 = vpop.f32.mrb[37].mxu0  ;;  %v5841_v38 = vpop.f32.mrb[41].mxu1 }
 0x98f   : > { %v5820_v61 = vadd.f32 %v5819_v29, %v5818_v27  ;;  %v5842_v43 = vadd.f32 %v5841_v38, %v5840_v28  ;;  %v5821_v41 = vpop.f32.mrb[38].mxu0  ;;  %v5843_v13 = vpop.f32.mrb[42].mxu1 }
 0x990   : > { %v5822_v58 = vpop.f32.mrb[39].mxu0  ;;  %v5844_v32 = vpop.f32.mrb[43].mxu1 }
 0x991   : > { %v5021_v34 = vadd.f32 %v5820_v61, %v5625_v12  ;;  %v5823_v2 = vadd.f32 %v5822_v58, %v5821_v41  ;;  %v5845_v6 = vadd.f32 %v5844_v32, %v5843_v13 }
 0x993   : > { %v5062_v23 = vadd.f32 %v5842_v43, %v5021_v34  ;;  %v5024_v14 = vadd.f32 %v5823_v2, %v5625_v12 }
 0x995   : > { %v5065_v36 = vadd.f32 %v5845_v6, %v5024_v14 }
 0x9ad   : > { %v5862_v37 = vpop.f32.mrb[40].mxu0  ;;  %v5884_v19 = vpop.f32.mrb[44].mxu1 }
 0x9ae   : > { %v5863_v39 = vpop.f32.mrb[41].mxu0  ;;  %v5885_v40 = vpop.f32.mrb[45].mxu1 }
 0x9af   : > { %v5864_v45 = vadd.f32 %v5863_v39, %v5862_v37  ;;  %v5886_v48 = vadd.f32 %v5885_v40, %v5884_v19  ;;  %v5865_v30 = vpop.f32.mrb[42].mxu0  ;;  %v5887_v49 = vpop.f32.mrb[46].mxu1 }
 0x9b0   : > { %v5866_v50 = vpop.f32.mrb[43].mxu0  ;;  %v5888_v51 = vpop.f32.mrb[47].mxu1 }
 0x9b1   : > { %v5103_v52 = vadd.f32 %v5864_v45, %v5062_v23  ;;  %v5867_v47 = vadd.f32 %v5866_v50, %v5865_v30  ;;  %v5889_v33 = vadd.f32 %v5888_v51, %v5887_v49  ;;  %v5755_v50 = vld [vmem:[%s601_s18] ss:$0 sm:$0xff] }
 0x9b3   : > { %v5144_v57 = vadd.f32 %v5886_v48, %v5103_v52  ;;  %v5106_v59 = vadd.f32 %v5867_v47, %v5065_v36  ;;  %v5754_v48 = vld [vmem:[%s598_s14] ss:$0 sm:$0xff]  ;;  %s6292_s14 = scalar_lea.vmem %s5369_s17, 256 }
 0x9b4   : > { %p6293_p6 = scmp.ne.s32.totalorder %s5369_s17, %s6292_s14  ;;  %p6300_p10 = scmp.lt.s32.totalorder %s6292_s14, %s6292_s14 }
 0x9b5   : > { %v5147_v60 = vadd.f32 %v5889_v33, %v5106_v59 }
 0x9b6   : > { %p6294_p7 = pnand %p6293_p6, %p6078_p5  ;;  %p6301_p11 = por %p6300_p10, %p6299_p9 }
 0x9b8   : > { %p6295_p8 = pneg %p6294_p7 }
 0x9ba   : > { %p6302_p12 = pnand %p6301_p11, %p6295_p8 }
 0x9cd   : > { %v5906_v35 = vpop.f32.mrb[44].mxu0 }
 0x9ce   : > { %v5928_v20 = vpop.f32.mrb[48].mxu1  ;;  %v5907_v18 = vpop.f32.mrb[45].mxu0 }
 0x9cf   : > { %v5908_v3 = vadd.f32 %v5907_v18, %v5906_v35  ;;  %v5929_v44 = vpop.f32.mrb[49].mxu1  ;;  %v5909_v55 = vpop.f32.mrb[46].mxu0 }
 0x9d0   : > { %v5930_v26 = vadd.f32 %v5929_v44, %v5928_v20  ;;  %v5931_v31 = vpop.f32.mrb[50].mxu1  ;;  %v5910_v53 = vpop.f32.mrb[47].mxu0 }
 0x9d1   : > { %v5185_v42 = vadd.f32 %v5908_v3, %v5144_v57  ;;  %v5911_v17 = vadd.f32 %v5910_v53, %v5909_v55  ;;  %v5932_v54 = vpop.f32.mrb[51].mxu1 }
 0x9d2   : > { %v5933_v21 = vadd.f32 %v5932_v54, %v5931_v31 }
 0x9d3   : > { %v5226_v16 = vadd.f32 %v5930_v26, %v5185_v42  ;;  %v5188_v62 = vadd.f32 %v5911_v17, %v5147_v60 }
 0x9d5   : > { %v5229_v1 = vadd.f32 %v5933_v21, %v5188_v62 }
 0x9ed   : > { %v5950_v5 = vpop.f32.mrb[48].mxu0 }
 0x9ee   : > { %v5972_v7 = vpop.f32.mrb[52].mxu1  ;;  %v5951_v8 = vpop.f32.mrb[49].mxu0 }
 0x9ef   : > { %v5952_v9 = vadd.f32 %v5951_v8, %v5950_v5  ;;  %v5973_v10 = vpop.f32.mrb[53].mxu1  ;;  %v5953_v63 = vpop.f32.mrb[50].mxu0 }
 0x9f0   : > { %v5974_v0 = vadd.f32 %v5973_v10, %v5972_v7  ;;  %v5975_v4 = vpop.f32.mrb[54].mxu1  ;;  %v5954_v22 = vpop.f32.mrb[51].mxu0 }
 0x9f1   : > { %v5267_v46 = vadd.f32 %v5952_v9, %v5226_v16  ;;  %v5955_v24 = vadd.f32 %v5954_v22, %v5953_v63  ;;  %v5976_v56 = vpop.f32.mrb[55].mxu1 }
 0x9f2   : > { %v5977_v25 = vadd.f32 %v5976_v56, %v5975_v4 }
 0x9f3   : > { %v5308_v27 = vadd.f32 %v5974_v0, %v5267_v46  ;;  %v5270_v28 = vadd.f32 %v5955_v24, %v5229_v1 }
 0x9f5   : > { %v5311_v12 = vadd.f32 %v5977_v25, %v5270_v28  ;;  %v5314_v29 = vadd.f32 %v5308_v27, %v6904_v11 }
 0x9f7   : > { %v5318_v38 = vsel %vm638_vm2, %v5314_v29, 0.0  ;;  %v5315_v61 = vadd.f32 %v5311_v12, %v6906_v15 }
 0x9f8   : > { %5319 = vadd.xlane.f32.xlu0 %v5318_v38 }
 0x9f9   : > { %v5321_v43 = vsel %vm638_vm2, %v5315_v61, 0.0 }
 0x9fa   : > { %5322 = vadd.xlane.f32.xlu1 %v5321_v43 }
 0xa85   : > { %v5320_v41 = vpop.xlane.xlu0 %5319 }
 0xa86   : > { %v5324_v13 = vmul.f32 0.03125, %v5320_v41 }
 0xa87   : > { %v5323_v58 = vpop.xlane.xlu1 %5322 }
 0xa88   : > { %v5326_v32 = vsub.f32 %v5314_v29, %v5324_v13  ;;  %v5325_v34 = vmul.f32 0.03125, %v5323_v58 }
 0xa8a   : > { %v5327_v2 = vsub.f32 %v5315_v61, %v5325_v34  ;;  %v5328_v6 = vmul.f32 %v5326_v32, %v5326_v32 }
 0xa8c   : > { %v5330_v23 = vsel %vm638_vm2, %v5328_v6, 0.0  ;;  %v5329_v14 = vmul.f32 %v5327_v2, %v5327_v2 }
 0xa8d   : > { %5331 = vadd.xlane.f32.xlu0 %v5330_v23 }
 0xa8e   : > { %v5333_v11 = vsel %vm638_vm2, %v5329_v14, 0.0 }
 0xa8f   : > { %5334 = vadd.xlane.f32.xlu1 %v5333_v11 }
 0xb1a   : > { %v5332_v15 = vpop.xlane.xlu0 %5331 }
 0xb1b   : > { %v5336_v36 = vmul.f32 0.03125, %v5332_v15 }
 0xb1c   : > { %v5335_v37 = vpop.xlane.xlu1 %5334 }
 0xb1d   : > { %v5338_v19 = vadd.f32 1e-05, %v5336_v36  ;;  %v5337_v39 = vmul.f32 0.03125, %v5335_v37 }
 0xb1f   : > { %6286 = vrsqrt.f32 %v5338_v19  ;;  %v5339_v40 = vadd.f32 1e-05, %v5337_v39 }
 0xb21   : > { %6288 = vrsqrt.f32 %v5339_v40 }
 0xb29   : > { %v6287_v45 = vpop.eup %6286 }
 0xb2a   : > { %v5342_v30 = vmul.f32 %v6287_v45, %v5326_v32 }
 0xb2b   : > { %v6289_v49 = vpop.eup %6288 }
 0xb2c   : > { %v5350_v51 = vmul.f32 %v5754_v48, %v5342_v30  ;;  %v5343_v52 = vmul.f32 %v6289_v49, %v5327_v2 }
 0xb2e   : > { %v5351_v47 = vmul.f32 %v5754_v48, %v5343_v52  ;;  %v5358_v33 = vadd.f32 %v5755_v50, %v5350_v51 }
 0xb30   : > { %v5359_v57 = vadd.f32 %v5755_v50, %v5351_v47  ;;  %5360 = vst.msk [vmem:[#allocation2] sm:$0xff] %vm638_vm2, %v5358_v33 }
 0xb32   : > { %5361 = vst.msk [vmem:[#allocation2 + $0x8] sm:$0xff] %vm638_vm2, %v5359_v57 }
 0xb33   : > { %6305 = shalt.err (!%p6302_p12)
}
 0xb34   : > { %s7231_s30 = sld [smem:[#allocation9_spill]] }
 0xb3a   : > { %s6306_s21 = scalar_lea.hbm %s7231_s30, 256 }
 0xb3b   : > { %p6307_p13 = scmp.ne.s32.totalorder %s7231_s30, %s6306_s21  ;;  %p6312_p2 = scmp.lt.u32.totalorder %s6306_s21, %s7231_s30 }
 0xb3d   : > { %p6308_p0 = pnand %p6307_p13, %p6078_p5 }
 0xb3f   : > { %p6309_p1 = pneg %p6308_p0 }
 0xb41   : > { %p6314_p3 = pnand %p6312_p2, %p6309_p1 }
 0xb43   : > { %6317 = shalt.err (!%p6314_p3)
}
 0xb44   : > { %s6344_s28 = smov 128  }
 0xb45   : > { %6075 = dma.vmem_to_hbm [thread:$0]  (%p6078_p5), %s5369_s17, 256, %s7231_s30, [#allocation3], %s6344_s28, %s6344_s28, %s6340_s22  }
 0xb46   : > { %6323 = dma.done.wait (%p6078_p5), [#allocation3], 256  }
 0xb47   : > { %6325 = vsyncadd (%p6078_p5), [#allocation3], 4294967040 }
 0xb48 PF: > { %s7232_s25 = sld [smem:[#allocation5_spill]] }
 0xb4e   : > { %s24_s25 = sadd.s32 1, %s7232_s25  }
 0xb4f   : > { %p21_p4 = scmp.ge.s32.totalorder %s24_s25, 4  }
 0xb51   :  { %23 = sbr.rel (!%p21_p4) target bundleno = 6 (0x6), region = 136 }
 0xb58   :  { %5384 = vsyncpa [#allocation3], 1 }
 0xb59   :  { %5386 = vsyncpa [#allocation3 + $0x1], 1 }

</bundles_post_ra>
